<compile_context>
chip_gen: v5e
topology: v5e:2x2
jax: 0.10.0
libtpu: 0.0.40
codegen_flags: <defaults>
</compile_context>

<pallas_src>
import jax
import jax.numpy as jnp
from jax.experimental import pallas as pl
from jax.experimental.pallas import tpu as pltpu


def _scaled_conv1x1_kernel(x_ref, s_ref, w_ref, o_ref):
    # Fold per-channel scale into the (small) weight block: (Cb, Cin)*(1, Cin).
    # Multiply in f32, cast to bf16 for the MXU feed.
    ws = (w_ref[...].astype(jnp.float32) * s_ref[...]).astype(jnp.bfloat16)
    # 1x1 conv == matmul on the MXU; bf16 inputs, f32 accumulation.
    o_ref[...] = jnp.dot(
        ws, x_ref[...], preferred_element_type=jnp.float32
    ).astype(o_ref.dtype)


def _num_cout_blocks(cout):
    """Split Cout across TensorCores only on v7x (2 TCs/chip); otherwise the
    extra grid step is pure overhead on v5e/v6e (1 TC/chip)."""
    try:
        kind = jax.devices()[0].device_kind.lower()
        if ("v7" in kind or "7x" in kind) and cout % 2 == 0 and (cout // 2) % 8 == 0:
            return 2
    except Exception:
        pass
    return 1


def mul_conv1x1(scale_nc11, x_nchw, w_oihw):
    """Implements: conv2d_1x1(scale * x).
    scale: (1,Cin,1,1), x: (N,Cin,H,W), w: (Cout,Cin,1,1). Returns f32 NCHW."""
    N, Cin, H, W = x_nchw.shape
    Cout = w_oihw.shape[0]
    HW = H * W
    CB = _num_cout_blocks(Cout)
    Cb = Cout // CB

    # Free views only — no XLA transposes. bf16 casts on the two large MXU
    # operands; with allow_input_fusion XLA fuses the casts into the kernel's
    # input DMA path instead of materializing bf16 copies in HBM.
    # (Ideally x / W would already live in HBM as bf16 upstream of this call.)
    x3d = x_nchw.reshape(N, Cin, HW).astype(jnp.bfloat16)
    s2d = scale_nc11.reshape(1, Cin).astype(jnp.float32)
    w2d = w_oihw.reshape(Cout, Cin).astype(jnp.bfloat16)

    flops = 2 * N * HW * Cin * Cout + 2 * Cout * Cin
    bytes_accessed = (
        2 * N * Cin * HW          # x  (bf16)
        + 4 * Cin                 # scale (f32)
        + 2 * Cout * Cin          # W  (bf16)
        + 4 * N * Cout * HW       # out (f32)
    )

    out3d = pl.pallas_call(
        _scaled_conv1x1_kernel,
        out_shape=jax.ShapeDtypeStruct((N, Cout, HW), jnp.float32),
        grid=(N, CB),
        in_specs=[
            pl.BlockSpec((None, Cin, HW), lambda n, c: (n, 0, 0)),  # x[n] (Cin,HW)
            pl.BlockSpec((1, Cin), lambda n, c: (0, 0)),            # scale (1,Cin)
            pl.BlockSpec((Cb, Cin), lambda n, c: (c, 0)),           # W block
        ],
        out_specs=pl.BlockSpec((None, Cb, HW), lambda n, c: (n, c, 0)),
        compiler_params=pltpu.CompilerParams(
            dimension_semantics=("parallel", "parallel"),
            vmem_limit_bytes=32 * 1024 * 1024,
            allow_input_fusion=[True, True, True],
        ),
        cost_estimate=pl.CostEstimate(
            flops=flops, transcendentals=0, bytes_accessed=bytes_accessed),
    )(x3d, s2d, w2d)

    return out3d.reshape(N, Cout, H, W)  # free view back to NCHW


if __name__ == "__main__":
    # Shapes from the PyTorch module spec (already small).
    N, Cin, H, W, Cout = 1, 864, 14, 14, 144

    key = jax.random.PRNGKey(0)
    kx, ks, kw = jax.random.split(key, 3)

    x296 = jax.random.normal(kx, (N, Cin, H, W), dtype=jnp.float32)
    x301 = jax.random.normal(ks, (1, Cin, 1, 1), dtype=jnp.float32)
    # Conv2d default init bound = 1/sqrt(fan_in)
    bound = 1.0 / jnp.sqrt(jnp.float32(Cin))
    w = jax.random.uniform(kw, (Cout, Cin, 1, 1), dtype=jnp.float32,
                           minval=-bound, maxval=bound)

    out = mul_conv1x1(x301, x296, w)
    out = jax.block_until_ready(out)

    # Reference (plain JAX, full f32) — matches PyTorch forward: conv(x301 * x296).
    # Tolerance loosened to cover bf16 operand quantization (f32 accumulation).
    ref = jnp.einsum("nchw,oc->nohw", x296 * x301, w.reshape(Cout, Cin))
    assert out.shape == (N, Cout, H, W), out.shape
    assert jnp.allclose(out, ref, atol=3e-2, rtol=3e-2), "mismatch vs reference"

    print("KERNEL_OK")
</pallas_src>

<mosaic_0001>
module attributes {stable_mosaic.version = 11 : i64} {
  func.func @_scaled_conv1x1_kernel(%arg0: i32, %arg1: i32, %arg2: memref<1x864x196xbf16, #tpu.memory_space<vmem>>, %arg3: memref<1x864xf32, #tpu.memory_space<vmem>>, %arg4: memref<144x864xbf16, #tpu.memory_space<vmem>>, %arg5: memref<1x144x196xf32, #tpu.memory_space<vmem>>) attributes {dimension_semantics = [#tpu.dimension_semantics<parallel>, #tpu.dimension_semantics<parallel>], iteration_bounds = array<i64: 1, 1>, scalar_prefetch = 0 : i64, scratch_operands = 0 : i64, tpu.core_type = #tpu.core_type<tc>, window_params = [{transform_indices = @transform_0, window_bounds = array<i64: 1, 864, 196>}, {pipeline_mode = #tpu.pipeline_mode<synchronous>, transform_indices = @transform_1, window_bounds = array<i64: 1, 864>}, {transform_indices = @transform_2, window_bounds = array<i64: 144, 864>}, {transform_indices = @transform_3, window_bounds = array<i64: 1, 144, 196>}]} {
    %c0 = arith.constant 0 : index
    %c0_0 = arith.constant 0 : index
    %0 = vector.load %arg4[%c0, %c0_0] : memref<144x864xbf16, #tpu.memory_space<vmem>>, vector<144x864xbf16>
    %1 = arith.extf %0 : vector<144x864xbf16> to vector<144x864xf32>
    %c0_1 = arith.constant 0 : index
    %c0_2 = arith.constant 0 : index
    %2 = vector.load %arg3[%c0_1, %c0_2] : memref<1x864xf32, #tpu.memory_space<vmem>>, vector<1x864xf32>
    %3 = vector.broadcast %2 : vector<1x864xf32> to vector<144x864xf32>
    %4 = arith.mulf %1, %3 : vector<144x864xf32>
    %5 = arith.truncf %4 : vector<144x864xf32> to vector<144x864xbf16>
    %c0_3 = arith.constant 0 : index
    %c0_4 = arith.constant 0 : index
    %c0_5 = arith.constant 0 : index
    %6 = vector.load %arg2[%c0_3, %c0_4, %c0_5] : memref<1x864x196xbf16, #tpu.memory_space<vmem>>, vector<1x864x196xbf16>
    %7 = vector.shape_cast %6 : vector<1x864x196xbf16> to vector<864x196xbf16>
    %cst = arith.constant dense<0.000000e+00> : vector<144x196xf32>
    %8 = tpu.matmul %5, %7, %cst {dimension_numbers = #tpu.dot_dimension_numbers<[1], [0], [0], [1], [0, 0, 1, 1], [], []>} : vector<144x864xbf16>, vector<864x196xbf16>, vector<144x196xf32> -> vector<144x196xf32>
    %c0_6 = arith.constant 0 : index
    %c0_7 = arith.constant 0 : index
    %c0_8 = arith.constant 0 : index
    %9 = vector.load %arg5[%c0_6, %c0_7, %c0_8] : memref<1x144x196xf32, #tpu.memory_space<vmem>>, vector<1x144x196xf32>
    %10 = vector.shape_cast %9 : vector<1x144x196xf32> to vector<144x196xf32>
    %11 = vector.shape_cast %8 : vector<144x196xf32> to vector<1x144x196xf32>
    tpu.vector_store %arg5[%c0_6, %c0_7, %c0_8], %11 {strides = array<i32>} : memref<1x144x196xf32, #tpu.memory_space<vmem>>, vector<1x144x196xf32>,
    return
  }
  func.func @transform_0(%arg0: i32, %arg1: i32) -> (i32, i32, i32) {
    %c0_i32 = arith.constant 0 : i32
    %c0_i32_0 = arith.constant 0 : i32
    %c0_i32_1 = arith.constant 0 : i32
    return %arg0, %c0_i32, %c0_i32_0 : i32, i32, i32
  }
  func.func @transform_1(%arg0: i32, %arg1: i32) -> (i32, i32) {
    %c0_i32 = arith.constant 0 : i32
    %c0_i32_0 = arith.constant 0 : i32
    %c0_i32_1 = arith.constant 0 : i32
    return %c0_i32, %c0_i32_0 : i32, i32
  }
  func.func @transform_2(%arg0: i32, %arg1: i32) -> (i32, i32) {
    %c0_i32 = arith.constant 0 : i32
    %c0_i32_0 = arith.constant 0 : i32
    return %arg1, %c0_i32 : i32, i32
  }
  func.func @transform_3(%arg0: i32, %arg1: i32) -> (i32, i32, i32) {
    %c0_i32 = arith.constant 0 : i32
    %c0_i32_0 = arith.constant 0 : i32
    return %arg0, %arg1, %c0_i32 : i32, i32, i32
  }
}

</mosaic_0001>

<bundles_post_ra>
// kernel: tpu_custom_call.1
= control target key start
LH: loop header
LB: loop body
LE: loop exit
PB: predicated region body
PF: predicated region fallthrough
CT: control target
= control target key end

     0   :  { %s4004_s0 = inlined_call_operand.vmem [shape: bf16[1,864,196], index: 0, kind: input, shape index: {}]   ;;  %s4005_s1 = inlined_call_operand.vmem [shape: f32[1,864], index: 1, kind: input, shape index: {}]   ;;  %s4006_s2 = inlined_call_operand.vmem [shape: bf16[144,864], index: 2, kind: input, shape index: {}]   ;;  %s4007_s3 = inlined_call_operand.hbm [shape: f32[1,144,196], index: 3, kind: output, shape index: {}]  }
   0x1   :  { %v1964_v0 = vld [vmem:[%s4004_s0 + $0x70] sm:$0xf]  ;;  %v2371_v1 = vld [vmem:[%s4004_s0 + $0x74] sm:$0xf0]  ;;  %v1956_v5 = vld [vmem:[%s4004_s0 + $0x60] sm:$0xf] }
   0x2   :  { %v2028_v2 = vld [vmem:[%s4004_s0 + $0xf0] sm:$0xf]  ;;  %v1965_v3 = vor.u32 %v2371_v1, %v1964_v0  ;;  %v2387_v4 = vld [vmem:[%s4004_s0 + $0xf4] sm:$0xf0]  ;;  %v2369_v6 = vld [vmem:[%s4004_s0 + $0x64] sm:$0xf0] }
   0x3   :  { %v2029_v7 = vor.u32 %v2387_v4, %v2028_v2  ;;  %v2020_v8 = vld [vmem:[%s4004_s0 + $0xe0] sm:$0xf]  ;;  %v2385_v9 = vld [vmem:[%s4004_s0 + $0xe4] sm:$0xf0]  ;;  %v1957_v10 = vor.u32 %v2369_v6, %v1956_v5  ;;  %v1948_v12 = vld [vmem:[%s4004_s0 + $0x50] sm:$0xf] }
   0x4   :  { %1095 = vmatpush.bf16.msra.mxu0 %v1965_v3  ;;  %2464 = vmatpush.bf16.msra.mxu2 %v1965_v3  ;;  %v2021_v11 = vor.u32 %v2385_v9, %v2020_v8  ;;  %v2367_v13 = vld [vmem:[%s4004_s0 + $0x54] sm:$0xf0]  ;;  %v2012_v14 = vld [vmem:[%s4004_s0 + $0xd0] sm:$0xf]  ;;  %v1940_v18 = vld [vmem:[%s4004_s0 + $0x40] sm:$0xf] }
   0x5   :  { %1149 = vmatpush.bf16.msra.mxu1 %v2029_v7  ;;  %2472 = vmatpush.bf16.msra.mxu3 %v2029_v7  ;;  %v2383_v15 = vld [vmem:[%s4004_s0 + $0xd4] sm:$0xf0]  ;;  %v1949_v16 = vor.u32 %v2367_v13, %v1948_v12  ;;  %v2365_v19 = vld [vmem:[%s4004_s0 + $0x44] sm:$0xf0]  ;;  %v2004_v20 = vld [vmem:[%s4004_s0 + $0xc0] sm:$0xf] }
   0x6   :  { %v2013_v17 = vor.u32 %v2383_v15, %v2012_v14  ;;  %v2381_v21 = vld [vmem:[%s4004_s0 + $0xc4] sm:$0xf0]  ;;  %v1941_v22 = vor.u32 %v2365_v19, %v1940_v18  ;;  %v1932_v24 = vld [vmem:[%s4004_s0 + $0x30] sm:$0xf]  ;;  %v2363_v25 = vld [vmem:[%s4004_s0 + $0x34] sm:$0xf0] }
   0x7   :  { %v2005_v23 = vor.u32 %v2381_v21, %v2004_v20  ;;  %v1996_v26 = vld [vmem:[%s4004_s0 + $0xb0] sm:$0xf]  ;;  %v2379_v27 = vld [vmem:[%s4004_s0 + $0xb4] sm:$0xf0]  ;;  %v1933_v28 = vor.u32 %v2363_v25, %v1932_v24  ;;  %v1924_v30 = vld [vmem:[%s4004_s0 + $0x20] sm:$0xf] }
   0x8   :  { %1096 = vmatpush.bf16.msra.mxu0 %v1957_v10  ;;  %2465 = vmatpush.bf16.msra.mxu2 %v1957_v10  ;;  %v1997_v29 = vor.u32 %v2379_v27, %v1996_v26  ;;  %v2361_v31 = vld [vmem:[%s4004_s0 + $0x24] sm:$0xf0]  ;;  %v1988_v32 = vld [vmem:[%s4004_s0 + $0xa0] sm:$0xf] }
   0x9   :  { %1150 = vmatpush.bf16.msra.mxu1 %v2021_v11  ;;  %2473 = vmatpush.bf16.msra.mxu3 %v2021_v11  ;;  %v2377_v33 = vld [vmem:[%s4004_s0 + $0xa4] sm:$0xf0]  ;;  %v16_v34 = vld [vmem:[%s4006_s2] sm:$0xff] }
   0xa   :  { %v2611_v35 = vld [vmem:[%s4005_s1] sm:$0x7f] }
   0xc   :  { %1097 = vmatpush.bf16.msra.mxu0 %v1949_v16  ;;  %2466 = vmatpush.bf16.msra.mxu2 %v1949_v16 }
   0xd   :  { %1151 = vmatpush.bf16.msra.mxu1 %v2013_v17  ;;  %2474 = vmatpush.bf16.msra.mxu3 %v2013_v17 }
  0x10   :  { %1098 = vmatpush.bf16.msra.mxu0 %v1941_v22  ;;  %2467 = vmatpush.bf16.msra.mxu2 %v1941_v22 }
  0x11   :  { %1152 = vmatpush.bf16.msra.mxu1 %v2005_v23  ;;  %2475 = vmatpush.bf16.msra.mxu3 %v2005_v23 }
  0x12   :  { %8 = vsyncpa [#allocation3], 0  ;;  %v1925_v36 = vor.u32 %v2361_v31, %v1924_v30  ;;  %v20_v37 = vld [vmem:[%s4006_s2 + $0x1c] sm:$0xff]  ;;  %v60_v39 = vld [vmem:[%s4006_s2 + $0x134] sm:$0xff]  ;;  %v1989_v40 = vor.u32 %v2377_v33, %v1988_v32  ;;  %v88_v45 = vunpack.c.l.bf16 %v16_v34  ;;  %v2635_v46 = vperm.slane %v2611_v35, 0  ;;  %s1894_s22 = sshll.u32 %s4007_s3, 4  ;;  %s1895_s22 = int_to_ptr.hbm [resolvable:$true] %s1894_s22 }
  0x13   :  { %v56_v38 = vld [vmem:[%s4006_s2 + $0x118] sm:$0xff]  ;;  %v1916_v41 = vld [vmem:[%s4004_s0 + $0x10] sm:$0xf]  ;;  %v89_v47 = vunpack.c.h.bf16 %v16_v34  ;;  %v1908_v48 = vld [vmem:[%s4004_s0] sm:$0xf]  ;;  %v95_v50 = vunpack.c.l.bf16 %v20_v37  ;;  %v165_v52 = vunpack.c.l.bf16 %v60_v39  ;;  %v2644_v53 = vperm.slane %v2611_v35, 1 }
  0x14   :  { %1099 = vmatpush.bf16.msra.mxu0 %v1933_v28  ;;  %2468 = vmatpush.bf16.msra.mxu2 %v1933_v28  ;;  %v2359_v42 = vld [vmem:[%s4004_s0 + $0x14] sm:$0xf0]  ;;  %v1980_v43 = vld [vmem:[%s4004_s0 + $0x90] sm:$0xf]  ;;  %v2357_v49 = vld [vmem:[%s4004_s0 + $0x4] sm:$0xf0]  ;;  %v158_v51 = vunpack.c.l.bf16 %v56_v38  ;;  %v96_v55 = vunpack.c.h.bf16 %v20_v37  ;;  %v159_v56 = vunpack.c.h.bf16 %v56_v38  ;;  %v166_v57 = vunpack.c.h.bf16 %v60_v39 }
  0x15   :  { %1153 = vmatpush.bf16.msra.mxu1 %v1997_v29  ;;  %2476 = vmatpush.bf16.msra.mxu3 %v1997_v29  ;;  %v2375_v44 = vld [vmem:[%s4004_s0 + $0x94] sm:$0xf0]  ;;  %v1917_v54 = vor.u32 %v2359_v42, %v1916_v41  ;;  %v1909_v59 = vor.u32 %v2357_v49, %v1908_v48  ;;  %v1972_v60 = vld [vmem:[%s4004_s0 + $0x80] sm:$0xf]  ;;  %v2373_v61 = vld [vmem:[%s4004_s0 + $0x84] sm:$0xf0]  ;;  %v230_v62 = vmul.f32 %v2635_v46, %v88_v45 }
  0x16   :  { %v1981_v58 = vor.u32 %v2375_v44, %v1980_v43  ;;  %v2220_v63 = vld [vmem:[%s4004_s0 + $0x270] sm:$0xf]  ;;  %v237_v0 = vmul.f32 %v2635_v46, %v95_v50  ;;  %v300_v1 = vmul.f32 %v2635_v46, %v158_v51  ;;  %v307_v2 = vmul.f32 %v2635_v46, %v165_v52  ;;  %v2435_v4 = vld [vmem:[%s4004_s0 + $0x274] sm:$0xf0]  ;;  %v2212_v17 = vld [vmem:[%s4004_s0 + $0x260] sm:$0xf] }
  0x17   :  { %v231_v3 = vmul.f32 %v2644_v53, %v89_v47  ;;  %v2284_v5 = vld [vmem:[%s4004_s0 + $0x2f0] sm:$0xf]  ;;  %v2451_v6 = vld [vmem:[%s4004_s0 + $0x2f4] sm:$0xf0]  ;;  %v238_v7 = vmul.f32 %v2644_v53, %v96_v55  ;;  %v301_v8 = vmul.f32 %v2644_v53, %v159_v56  ;;  %v308_v9 = vmul.f32 %v2644_v53, %v166_v57  ;;  %v2433_v20 = vld [vmem:[%s4004_s0 + $0x264] sm:$0xf0] }
  0x18   :  { %1100 = vmatpush.bf16.msra.mxu0 %v1925_v36  ;;  %2469 = vmatpush.bf16.msra.mxu2 %v1925_v36  ;;  %v1973_v10 = vor.u32 %v2373_v61, %v1972_v60  ;;  %v2092_v11 = vld [vmem:[%s4004_s0 + $0x170] sm:$0xf]  ;;  %v2403_v12 = vld [vmem:[%s4004_s0 + $0x174] sm:$0xf0]  ;;  %v2221_v13 = vor.u32 %v2435_v4, %v2220_v63  ;;  %v2285_v14 = vor.u32 %v2451_v6, %v2284_v5  ;;  %v2276_v21 = vld [vmem:[%s4004_s0 + $0x2e0] sm:$0xf] }
  0x19   :  { %1154 = vmatpush.bf16.msra.mxu1 %v1989_v40  ;;  %2477 = vmatpush.bf16.msra.mxu3 %v1989_v40  ;;  %v2156_v15 = vld [vmem:[%s4004_s0 + $0x1f0] sm:$0xf]  ;;  %v2419_v16 = vld [vmem:[%s4004_s0 + $0x1f4] sm:$0xf0]  ;;  %v2687_v18 = vpack.c.bf16 %v237_v0, %v230_v62  ;;  %v2689_v19 = vpack.c.bf16 %v307_v2, %v300_v1  ;;  %v2449_v22 = vld [vmem:[%s4004_s0 + $0x2e4] sm:$0xf0]  ;;  %v2700_v23 = vpack.c.bf16 %v238_v7, %v231_v3 }
  0x1a   :  { %v2702_v24 = vpack.c.bf16 %v308_v9, %v301_v8  ;;  %v2093_v25 = vor.u32 %v2403_v12, %v2092_v11  ;;  %v2157_v26 = vor.u32 %v2419_v16, %v2156_v15  ;;  %v2084_v27 = vld [vmem:[%s4004_s0 + $0x160] sm:$0xf]  ;;  %v2401_v28 = vld [vmem:[%s4004_s0 + $0x164] sm:$0xf0]  ;;  %v2213_v29 = vor.u32 %v2433_v20, %v2212_v17  ;;  %v24_v31 = vld [vmem:[%s4006_s2 + $0x38] sm:$0xff]  ;;  %s2511_s23 = smov 256  }
  0x1b   :  { %v2277_v30 = vor.u32 %v2449_v22, %v2276_v21  ;;  %v2148_v32 = vld [vmem:[%s4004_s0 + $0x1e0] sm:$0xf]  ;;  %v2417_v33 = vld [vmem:[%s4004_s0 + $0x1e4] sm:$0xf0]  ;;  %v2204_v34 = vld [vmem:[%s4004_s0 + $0x250] sm:$0xf]  ;;  %v2085_v42 = vor.u32 %v2401_v28, %v2084_v27  ;;  %v102_v52 = vunpack.c.l.bf16 %v24_v31  ;;  %v103_v60 = vunpack.c.h.bf16 %v24_v31 }
  0x1c   :  { %1101 = vmatpush.bf16.msra.mxu0 %v1917_v54  ;;  %2470 = vmatpush.bf16.msra.mxu2 %v1917_v54  ;;  %v2431_v36 = vld [vmem:[%s4004_s0 + $0x254] sm:$0xf0]  ;;  %v2268_v37 = vld [vmem:[%s4004_s0 + $0x2d0] sm:$0xf]  ;;  %v2149_v43 = vor.u32 %v2417_v33, %v2148_v32  ;;  %v2196_v51 = vld [vmem:[%s4004_s0 + $0x240] sm:$0xf] }
  0x1d   :  { %1155 = vmatpush.bf16.msra.mxu1 %v1981_v58  ;;  %2478 = vmatpush.bf16.msra.mxu3 %v1981_v58  ;;  %v2447_v38 = vld [vmem:[%s4004_s0 + $0x2d4] sm:$0xf0]  ;;  %v64_v40 = vld [vmem:[%s4006_s2 + $0x150] sm:$0xff]  ;;  %v2205_v47 = vor.u32 %v2431_v36, %v2204_v34  ;;  %v2429_v57 = vld [vmem:[%s4004_s0 + $0x244] sm:$0xf0]  ;;  %v244_v9 = vmul.f32 %v2635_v46, %v102_v52  ;;  %v245_v16 = vmul.f32 %v2644_v53, %v103_v60  ;;  %vm1067_vm0 = vcmask 785408  }
  0x1e   :  { %v28_v39 = vld [vmem:[%s4006_s2 + $0x54] sm:$0xff]  ;;  %v68_v41 = vld [vmem:[%s4006_s2 + $0x16c] sm:$0xff]  ;;  %v2269_v48 = vor.u32 %v2447_v38, %v2268_v37  ;;  %v172_v55 = vunpack.c.l.bf16 %v64_v40  ;;  %v2260_v58 = vld [vmem:[%s4004_s0 + $0x2c0] sm:$0xf]  ;;  %v173_v62 = vunpack.c.h.bf16 %v64_v40  ;;  %v2197_v4 = vor.u32 %v2429_v57, %v2196_v51 }
  0x1f   :  { %v2076_v44 = vld [vmem:[%s4004_s0 + $0x150] sm:$0xf]  ;;  %v2399_v45 = vld [vmem:[%s4004_s0 + $0x154] sm:$0xf0]  ;;  %v109_v54 = vunpack.c.l.bf16 %v28_v39  ;;  %v179_v56 = vunpack.c.l.bf16 %v68_v41  ;;  %v110_v61 = vunpack.c.h.bf16 %v28_v39  ;;  %v180_v63 = vunpack.c.h.bf16 %v68_v41  ;;  %v2068_v2 = vld [vmem:[%s4004_s0 + $0x140] sm:$0xf] }
  0x20   :  { %1102 = vmatpush.bf16.msra.mxu0 %v1909_v59  ;;  %2471 = vmatpush.bf16.msra.mxu2 %v1909_v59  ;;  %v2140_v49 = vld [vmem:[%s4004_s0 + $0x1d0] sm:$0xf]  ;;  %v2415_v50 = vld [vmem:[%s4004_s0 + $0x1d4] sm:$0xf0]  ;;  %v2445_v59 = vld [vmem:[%s4004_s0 + $0x2c4] sm:$0xf0]  ;;  %v2077_v0 = vor.u32 %v2399_v45, %v2076_v44  ;;  %v314_v11 = vmul.f32 %v2635_v46, %v172_v55  ;;  %v315_v20 = vmul.f32 %v2644_v53, %v173_v62 }
  0x21   :  { %1156 = vmatpush.bf16.msra.mxu1 %v1973_v10  ;;  %2479 = vmatpush.bf16.msra.mxu3 %v1973_v10  ;;  %v2141_v1 = vor.u32 %v2415_v50, %v2140_v49  ;;  %v2397_v3 = vld [vmem:[%s4004_s0 + $0x144] sm:$0xf0]  ;;  %v2132_v5 = vld [vmem:[%s4004_s0 + $0x1c0] sm:$0xf]  ;;  %v2261_v7 = vor.u32 %v2445_v59, %v2260_v58  ;;  %v2188_v8 = vld [vmem:[%s4004_s0 + $0x230] sm:$0xf]  ;;  %v251_v10 = vmul.f32 %v2635_v46, %v109_v54 }
  0x22   :  { %v2413_v6 = vld [vmem:[%s4004_s0 + $0x1c4] sm:$0xf0]  ;;  %v321_v12 = vmul.f32 %v2635_v46, %v179_v56  ;;  %v2443_v15 = vld [vmem:[%s4004_s0 + $0x2b4] sm:$0xf0]  ;;  %v252_v17 = vmul.f32 %v2644_v53, %v110_v61  ;;  %v322_v21 = vmul.f32 %v2644_v53, %v180_v63  ;;  %v2069_v22 = vor.u32 %v2397_v3, %v2068_v2  ;;  %v2124_v28 = vld [vmem:[%s4004_s0 + $0x1b0] sm:$0xf] }
  0x23   :  { %1103 = vmatmul.bf16.vlgmr.msra.gmra.mxu0 %v2687_v18  ;;  %1128 = vmatmul.bf16.vlgmr.msra.gmra.mxu2 %v2689_v19  ;;  %v2395_v27 = vld [vmem:[%s4004_s0 + $0x134] sm:$0xf0]  ;;  %v2812_v32 = vpack.c.bf16 %v251_v10, %v244_v9  ;;  %v32_v39 = vld [vmem:[%s4006_s2 + $0x70] sm:$0xff]  ;;  %v2052_v40 = vld [vmem:[%s4004_s0 + $0x120] sm:$0xf]  ;;  %vm1852_vm1 = vcmask 556032  }
  0x24   :  { %1311 = vmatpush.bf16.msrb.mxu0 %v2221_v13  ;;  %1157 = vmatmul.bf16.vlgmr.msra.gmra.mxu1 %v2700_v23  ;;  %v2427_v13 = vld [vmem:[%s4004_s0 + $0x234] sm:$0xf0]  ;;  %v2814_v33 = vpack.c.bf16 %v321_v12, %v314_v11  ;;  %v2816_v34 = vpack.c.bf16 %v252_v17, %v245_v16  ;;  %v2818_v36 = vpack.c.bf16 %v322_v21, %v315_v20  ;;  %v2393_v41 = vld [vmem:[%s4004_s0 + $0x124] sm:$0xf0]  ;;  %v2116_v45 = vld [vmem:[%s4004_s0 + $0x1a0] sm:$0xf]  ;;  %v116_v55 = vunpack.c.l.bf16 %v32_v39 }
  0x25   :  { %1365 = vmatpush.bf16.msrb.mxu1 %v2285_v14  ;;  %1182 = vmatmul.bf16.vlgmr.msra.gmra.mxu3 %v2702_v24  ;;  %v2252_v14 = vld [vmem:[%s4004_s0 + $0x2b0] sm:$0xf]  ;;  %v76_v44 = vld [vmem:[%s4006_s2 + $0x1a4] sm:$0xff]  ;;  %v2053_v49 = vor.u32 %v2393_v41, %v2052_v40  ;;  %v2244_v52 = vld [vmem:[%s4004_s0 + $0x2a0] sm:$0xf] }
  0x26   :  { %1203 = vmatpush.bf16.msrb.mxu2 %v2093_v25  ;;  %1257 = vmatpush.bf16.msrb.mxu3 %v2157_v26  ;;  %v2133_v25 = vor.u32 %v2413_v6, %v2132_v5  ;;  %v2060_v26 = vld [vmem:[%s4004_s0 + $0x130] sm:$0xf]  ;;  %v2253_v31 = vor.u32 %v2443_v15, %v2252_v14  ;;  %v2425_v51 = vld [vmem:[%s4004_s0 + $0x224] sm:$0xf0]  ;;  %v2391_v59 = vld [vmem:[%s4004_s0 + $0x114] sm:$0xf0]  ;;  %v193_v63 = vunpack.c.l.bf16 %v76_v44  ;;  %v194_v6 = vunpack.c.h.bf16 %v76_v44 }
  0x27   :  { %v2061_v37 = vor.u32 %v2395_v27, %v2060_v26  ;;  %v2441_v54 = vld [vmem:[%s4004_s0 + $0x2a4] sm:$0xf0]  ;;  %v2044_v58 = vld [vmem:[%s4004_s0 + $0x110] sm:$0xf]  ;;  %v2423_v3 = vld [vmem:[%s4004_s0 + $0x214] sm:$0xf0] }
  0x28   :  { %1312 = vmatpush.bf16.msrb.mxu0 %v2213_v29  ;;  %v2411_v29 = vld [vmem:[%s4004_s0 + $0x1b4] sm:$0xf0]  ;;  %v2245_v57 = vor.u32 %v2441_v54, %v2244_v52  ;;  %v2108_v60 = vld [vmem:[%s4004_s0 + $0x190] sm:$0xf]  ;;  %v2036_v10 = vld [vmem:[%s4004_s0 + $0x100] sm:$0xf] }
  0x29   :  { %1366 = vmatpush.bf16.msrb.mxu1 %v2277_v30  ;;  %v2189_v30 = vor.u32 %v2427_v13, %v2188_v8  ;;  %v2125_v38 = vor.u32 %v2411_v29, %v2124_v28  ;;  %v2172_v2 = vld [vmem:[%s4004_s0 + $0x210] sm:$0xf]  ;;  %v2045_v8 = vor.u32 %v2391_v59, %v2044_v58  ;;  %v2439_v12 = vld [vmem:[%s4004_s0 + $0x294] sm:$0xf0]  ;;  %v258_v13 = vmul.f32 %v2635_v46, %v116_v55  ;;  %v2389_v14 = vld [vmem:[%s4004_s0 + $0x104] sm:$0xf0] }
  0x2a   :  { %1204 = vmatpush.bf16.msrb.mxu2 %v2085_v42  ;;  %1258 = vmatpush.bf16.msrb.mxu3 %v2149_v43  ;;  %v36_v42 = vld [vmem:[%s4006_s2 + $0x8c] sm:$0xff]  ;;  %v2100_v15 = vld [vmem:[%s4004_s0 + $0x180] sm:$0xf]  ;;  %v2405_v16 = vld [vmem:[%s4004_s0 + $0x184] sm:$0xf0]  ;;  %v336_v28 = vmul.f32 %v2644_v53, %v194_v6  ;;  %v2037_v29 = vor.u32 %v2389_v14, %v2036_v10 }
  0x2b   :  { %v72_v43 = vld [vmem:[%s4006_s2 + $0x188] sm:$0xff]  ;;  %v123_v61 = vunpack.c.l.bf16 %v36_v42  ;;  %v2236_v11 = vld [vmem:[%s4004_s0 + $0x290] sm:$0xf]  ;;  %v2164_v44 = vld [vmem:[%s4004_s0 + $0x200] sm:$0xf] }
  0x2c   :  { %1313 = vmatpush.bf16.msrb.mxu0 %v2205_v47  ;;  %v2409_v47 = vld [vmem:[%s4004_s0 + $0x1a4] sm:$0xf0]  ;;  %v186_v62 = vunpack.c.l.bf16 %v72_v43  ;;  %v187_v5 = vunpack.c.h.bf16 %v72_v43  ;;  %v2237_v17 = vor.u32 %v2439_v12, %v2236_v11  ;;  %v84_v43 = vld [vmem:[%s4006_s2 + $0x1dc] sm:$0xff] }
  0x2d   :  { %1367 = vmatpush.bf16.msrb.mxu1 %v2269_v48  ;;  %v2180_v48 = vld [vmem:[%s4004_s0 + $0x220] sm:$0xf]  ;;  %v2117_v50 = vor.u32 %v2409_v47, %v2116_v45  ;;  %v265_v20 = vmul.f32 %v2635_v46, %v123_v61  ;;  %v40_v40 = vld [vmem:[%s4006_s2 + $0xa8] sm:$0xff]  ;;  %v2332_v47 = vld [vmem:[%s4004_s0 + $0x350] sm:$0xf] }
  0x2e   :  { %1205 = vmatpush.bf16.msrb.mxu2 %v2077_v0  ;;  %1259 = vmatpush.bf16.msrb.mxu3 %v2141_v1  ;;  %v2181_v56 = vor.u32 %v2425_v51, %v2180_v48  ;;  %v117_v0 = vunpack.c.h.bf16 %v32_v39  ;;  %v2407_v1 = vld [vmem:[%s4004_s0 + $0x194] sm:$0xf0]  ;;  %v328_v21 = vmul.f32 %v2635_v46, %v186_v62  ;;  %v329_v27 = vmul.f32 %v2644_v53, %v187_v5  ;;  %v44_v41 = vld [vmem:[%s4006_s2 + $0xc4] sm:$0xff] }
  0x2f   :  { %v2109_v9 = vor.u32 %v2407_v1, %v2108_v60  ;;  %v2421_v45 = vld [vmem:[%s4004_s0 + $0x204] sm:$0xf0]  ;;  %v130_v52 = vunpack.c.l.bf16 %v40_v40  ;;  %v137_v58 = vunpack.c.l.bf16 %v44_v41  ;;  %v207_v60 = vunpack.c.l.bf16 %v84_v43  ;;  %v48_v14 = vld [vmem:[%s4006_s2 + $0xe0] sm:$0xff] }
  0x30   :  { %1314 = vmatpush.bf16.msrb.mxu0 %v2197_v4  ;;  %v124_v4 = vunpack.c.h.bf16 %v36_v42  ;;  %v2910_v39 = vpack.c.bf16 %v336_v28, %v329_v27  ;;  %v80_v42 = vld [vmem:[%s4006_s2 + $0x1c0] sm:$0xff]  ;;  %v2165_v48 = vor.u32 %v2421_v45, %v2164_v44  ;;  %v2437_v51 = vld [vmem:[%s4004_s0 + $0x284] sm:$0xf0]  ;;  %v131_v62 = vunpack.c.h.bf16 %v40_v40  ;;  %v2094_v27 = vld [vmem:[%s4004_s0 + $0x178] sm:$0xf0] }
  0x31   :  { %1368 = vmatpush.bf16.msrb.mxu1 %v2261_v7  ;;  %v2173_v7 = vor.u32 %v2423_v3, %v2172_v2  ;;  %v200_v59 = vunpack.c.l.bf16 %v80_v42  ;;  %v208_v1 = vunpack.c.h.bf16 %v84_v43  ;;  %v272_v2 = vmul.f32 %v2635_v46, %v130_v52  ;;  %v2368_v28 = vld [vmem:[%s4004_s0 + $0x64] sm:$0xf]  ;;  %v2324_v43 = vld [vmem:[%s4004_s0 + $0x340] sm:$0xf]  ;;  %v2461_v44 = vld [vmem:[%s4004_s0 + $0x344] sm:$0xf0] }
  0x32   :  { %1206 = vmatpush.bf16.msrb.mxu2 %v2069_v22  ;;  %1260 = vmatpush.bf16.msrb.mxu3 %v2133_v25  ;;  %v335_v22 = vmul.f32 %v2635_v46, %v193_v63  ;;  %v259_v25 = vmul.f32 %v2644_v53, %v117_v0  ;;  %v266_v26 = vmul.f32 %v2644_v53, %v124_v4  ;;  %v138_v63 = vunpack.c.h.bf16 %v44_v41 }
  0x33   :  { %1108 = vmatmul.bf16.gmra.mxu0 %v2812_v32  ;;  %1133 = vmatmul.bf16.gmra.mxu2 %v2814_v33  ;;  %4038 = vst [vmem:[#allocation5_spill] sm:$0xff] %v2910_v39  ;;  %v201_v0 = vunpack.c.h.bf16 %v80_v42  ;;  %v279_v3 = vmul.f32 %v2635_v46, %v137_v58  ;;  %v342_v4 = vmul.f32 %v2635_v46, %v200_v59  ;;  %v145_v40 = vunpack.c.h.bf16 %v48_v14 }
  0x34   :  { %1315 = vmatpush.bf16.msrb.mxu0 %v2189_v30  ;;  %1162 = vmatmul.bf16.gmra.mxu1 %v2816_v34  ;;  %v2101_v30 = vor.u32 %v2405_v16, %v2100_v15  ;;  %v349_v5 = vmul.f32 %v2635_v46, %v207_v60  ;;  %v273_v6 = vmul.f32 %v2644_v53, %v131_v62  ;;  %v52_v15 = vld [vmem:[%s4006_s2 + $0xfc] sm:$0xff]  ;;  %v17_v16 = vld [vmem:[%s4006_s2 + $0x8] sm:$0xff] }
  0x35   :  { %1369 = vmatpush.bf16.msrb.mxu1 %v2253_v31  ;;  %1187 = vmatmul.bf16.gmra.mxu3 %v2818_v36  ;;  %v2904_v31 = vpack.c.bf16 %v265_v20, %v258_v13  ;;  %v2960_v10 = vpack.c.bf16 %v279_v3, %v272_v2  ;;  %v2386_v20 = vld [vmem:[%s4004_s0 + $0xf4] sm:$0xf]  ;;  %v90_v45 = vunpack.c.l.bf16 %v17_v16  ;;  %v287_v59 = vmul.f32 %v2644_v53, %v145_v40 }
  0x36   :  { %1207 = vmatpush.bf16.msrb.mxu2 %v2061_v37  ;;  %1261 = vmatpush.bf16.msrb.mxu3 %v2125_v38  ;;  %v2906_v37 = vpack.c.bf16 %v335_v22, %v328_v21  ;;  %v2908_v38 = vpack.c.bf16 %v266_v26, %v259_v25  ;;  %v2962_v11 = vpack.c.bf16 %v349_v5, %v342_v4  ;;  %v2030_v21 = vld [vmem:[%s4004_s0 + $0xf8] sm:$0xf0]  ;;  %v2402_v22 = vld [vmem:[%s4004_s0 + $0x174] sm:$0xf]  ;;  %v144_v25 = vunpack.c.l.bf16 %v48_v14  ;;  %v22_v4 = vld [vmem:[%s4006_s2 + $0x2c] sm:$0xff] }
  0x37   :  { %v2033_v26 = vor.u32 %v2386_v20, %v2030_v21  ;;  %v2097_v41 = vor.u32 %v2402_v22, %v2094_v27  ;;  %v18_v3 = vld [vmem:[%s4006_s2 + $0x10] sm:$0xff]  ;;  %v2384_v5 = vld [vmem:[%s4004_s0 + $0xe4] sm:$0xf]  ;;  %v3065_v27 = vperm.slane %v2611_v35, 4  ;;  %v3068_v40 = vperm.slane %v2611_v35, 5 }
  0x38   :  { %1316 = vmatpush.bf16.msrb.mxu0 %v2181_v56  ;;  %v2370_v56 = vld [vmem:[%s4004_s0 + $0x74] sm:$0xf]  ;;  %4039 = vst [vmem:[#allocation6_spill] sm:$0xff] %v2962_v11 }
  0x39   :  { %1370 = vmatpush.bf16.msrb.mxu1 %v2245_v57  ;;  %v1966_v57 = vld [vmem:[%s4004_s0 + $0x78] sm:$0xf0]  ;;  %v2366_v14 = vld [vmem:[%s4004_s0 + $0x54] sm:$0xf] }
  0x3a   :  { %1208 = vmatpush.bf16.msrb.mxu2 %v2053_v49  ;;  %1262 = vmatpush.bf16.msrb.mxu3 %v2117_v50  ;;  %v2463_v49 = vld [vmem:[%s4004_s0 + $0x354] sm:$0xf0]  ;;  %v2228_v50 = vld [vmem:[%s4004_s0 + $0x280] sm:$0xf]  ;;  %v1969_v61 = vor.u32 %v2370_v56, %v1966_v57 }
  0x3b   :  { %v2333_v54 = vor.u32 %v2463_v49, %v2332_v47  ;;  %v2229_v55 = vor.u32 %v2437_v51, %v2228_v50  ;;  %v2325_v49 = vor.u32 %v2461_v44, %v2324_v43  ;;  %v152_v50 = vunpack.c.h.bf16 %v52_v15 }
  0x3c   :  { %1317 = vmatpush.bf16.msrb.mxu0 %v2173_v7  ;;  %v280_v7 = vmul.f32 %v2644_v53, %v138_v63  ;;  %v91_v51 = vunpack.c.h.bf16 %v17_v16 }
  0x3d   :  { %1371 = vmatpush.bf16.msrb.mxu1 %v2237_v17  ;;  %v21_v17 = vld [vmem:[%s4006_s2 + $0x24] sm:$0xff]  ;;  %v294_v60 = vmul.f32 %v2644_v53, %v152_v50 }
  0x3e   :  { %1209 = vmatpush.bf16.msrb.mxu2 %v2045_v8  ;;  %1263 = vmatpush.bf16.msrb.mxu3 %v2109_v9  ;;  %v343_v8 = vmul.f32 %v2644_v53, %v201_v0  ;;  %v350_v9 = vmul.f32 %v2644_v53, %v208_v1  ;;  %v2964_v12 = vpack.c.bf16 %v280_v7, %v273_v6  ;;  %v97_v47 = vunpack.c.l.bf16 %v21_v17  ;;  %v29_v53 = vld [vmem:[%s4006_s2 + $0x5c] sm:$0xff]  ;;  %v2022_v6 = vld [vmem:[%s4004_s0 + $0xe8] sm:$0xf0]  ;;  %v2400_v7 = vld [vmem:[%s4004_s0 + $0x164] sm:$0xf] }
  0x3f   :  { %v98_v52 = vunpack.c.h.bf16 %v21_v17  ;;  %v3026_v1 = vpack.c.bf16 %v294_v60, %v287_v59  ;;  %v111_v17 = vunpack.c.l.bf16 %v29_v53  ;;  %v30_v59 = vld [vmem:[%s4006_s2 + $0x64] sm:$0xff]  ;;  %v2382_v60 = vld [vmem:[%s4004_s0 + $0xd4] sm:$0xf] }
  0x40   :  { %1318 = vmatpush.bf16.msrb.mxu0 %v2165_v48  ;;  %v2966_v13 = vpack.c.bf16 %v350_v9, %v343_v8  ;;  %v3009_v48 = vperm.slane %v2611_v35, 2  ;;  %v2025_v8 = vor.u32 %v2384_v5, %v2022_v6  ;;  %v2086_v9 = vld [vmem:[%s4004_s0 + $0x168] sm:$0xf0] }
  0x41   :  { %1372 = vmatpush.bf16.msrb.mxu1 %v2229_v55  ;;  %v286_v55 = vmul.f32 %v2635_v46, %v144_v25  ;;  %v2089_v20 = vor.u32 %v2400_v7, %v2086_v9  ;;  %v92_v25 = vunpack.c.l.bf16 %v18_v3 }
  0x42   :  { %1210 = vmatpush.bf16.msrb.mxu2 %v2037_v29  ;;  %1264 = vmatpush.bf16.msrb.mxu3 %v2101_v30  ;;  %4040 = vst [vmem:[#allocation7_spill] sm:$0xff] %v2966_v13  ;;  %v1958_v29 = vld [vmem:[%s4004_s0 + $0x68] sm:$0xf0]  ;;  %v151_v30 = vunpack.c.l.bf16 %v52_v15  ;;  %v232_v57 = vmul.f32 %v3009_v48, %v90_v45  ;;  %v239_v58 = vmul.f32 %v3009_v48, %v97_v47  ;;  %v1950_v15 = vld [vmem:[%s4004_s0 + $0x58] sm:$0xf0] }
  0x43   :  { %1113 = vmatmul.bf16.gmra.mxu0 %v2904_v31  ;;  %1138 = vmatmul.bf16.gmra.mxu2 %v2906_v37  ;;  %v1961_v42 = vor.u32 %v2368_v28, %v1958_v29  ;;  %v1953_v21 = vor.u32 %v2366_v14, %v1950_v15  ;;  %v112_v28 = vunpack.c.h.bf16 %v29_v53  ;;  %v93_v29 = vunpack.c.h.bf16 %v18_v3  ;;  %v2459_v53 = vld [vmem:[%s4004_s0 + $0x334] sm:$0xf0]  ;;  %v2398_v3 = vld [vmem:[%s4004_s0 + $0x154] sm:$0xf] }
  0x44   :  { %1167 = vmatmul.bf16.gmra.mxu1 %v2908_v38  ;;  %1527 = vmatpush.bf16.msra.mxu0 %v2033_v26  ;;  %v293_v56 = vmul.f32 %v2635_v46, %v151_v30  ;;  %v3024_v0 = vpack.c.bf16 %v239_v58, %v232_v57  ;;  %v25_v46 = vld [vmem:[%s4006_s2 + $0x40] sm:$0xff]  ;;  %v99_v26 = vunpack.c.l.bf16 %v22_v4  ;;  %v100_v30 = vunpack.c.h.bf16 %v22_v4  ;;  %v37_v57 = vld [vmem:[%s4006_s2 + $0x94] sm:$0xff]  ;;  %v26_v58 = vld [vmem:[%s4006_s2 + $0x48] sm:$0xff] }
  0x45   :  { %1192 = vmatmul.bf16.gmra.mxu3 %v2910_v39  ;;  %1581 = vmatpush.bf16.msra.mxu1 %v2097_v41  ;;  %v104_v16 = vunpack.c.l.bf16 %v25_v46  ;;  %v105_v22 = vunpack.c.h.bf16 %v25_v46  ;;  %v234_v43 = vmul.f32 %v3065_v27, %v92_v25  ;;  %v2078_v4 = vld [vmem:[%s4004_s0 + $0x158] sm:$0xf0]  ;;  %v106_v9 = vunpack.c.l.bf16 %v26_v58 }
  0x46   :  { %1421 = vmatpush.bf16.msra.mxu2 %v2333_v54  ;;  %1473 = vmatpush.bf16.msra.mxu3 %v1969_v61  ;;  %v3012_v54 = vperm.slane %v2611_v35, 3  ;;  %v3022_v63 = vpack.c.bf16 %v293_v56, %v286_v55  ;;  %v241_v44 = vmul.f32 %v3065_v27, %v99_v26  ;;  %v242_v50 = vmul.f32 %v3068_v40, %v100_v30  ;;  %v33_v56 = vld [vmem:[%s4006_s2 + $0x78] sm:$0xff] }
  0x47   :  { %v246_v41 = vmul.f32 %v3009_v48, %v104_v16  ;;  %v2081_v6 = vor.u32 %v2398_v3, %v2078_v4  ;;  %v118_v7 = vunpack.c.l.bf16 %v33_v56  ;;  %v113_v14 = vunpack.c.l.bf16 %v30_v59 }
  0x48   :  { %v233_v61 = vmul.f32 %v3012_v54, %v91_v51  ;;  %v240_v62 = vmul.f32 %v3012_v54, %v98_v52  ;;  %1528 = vmatpush.bf16.msra.mxu0 %v2025_v8  ;;  %v247_v45 = vmul.f32 %v3012_v54, %v105_v22  ;;  %v254_v47 = vmul.f32 %v3012_v54, %v112_v28 }
  0x49   :  { %1582 = vmatpush.bf16.msra.mxu1 %v2089_v20  ;;  %v3080_v51 = vpack.c.bf16 %v241_v44, %v234_v43  ;;  %v125_v8 = vunpack.c.l.bf16 %v37_v57  ;;  %v119_v15 = vunpack.c.h.bf16 %v33_v56  ;;  %v126_v16 = vunpack.c.h.bf16 %v37_v57  ;;  %v45_v56 = vld [vmem:[%s4006_s2 + $0xcc] sm:$0xff] }
  0x4a   :  { %1474 = vmatpush.bf16.msra.mxu3 %v1961_v42  ;;  %1422 = vmatpush.bf16.msra.mxu2 %v2325_v49  ;;  %v3028_v2 = vpack.c.bf16 %v240_v62, %v233_v61  ;;  %v253_v42 = vmul.f32 %v3009_v48, %v111_v17  ;;  %v235_v49 = vmul.f32 %v3068_v40, %v93_v29  ;;  %v2014_v61 = vld [vmem:[%s4004_s0 + $0xd8] sm:$0xf0]  ;;  %v2316_v62 = vld [vmem:[%s4004_s0 + $0x330] sm:$0xf]  ;;  %v107_v17 = vunpack.c.h.bf16 %v26_v58  ;;  %v34_v58 = vld [vmem:[%s4006_s2 + $0x80] sm:$0xff] }
  0x4b   :  { %4042 = vst [vmem:[#allocation9_spill] sm:$0xff] %v3080_v51  ;;  %v3082_v52 = vpack.c.bf16 %v254_v47, %v247_v45  ;;  %v2017_v46 = vor.u32 %v2382_v60, %v2014_v61  ;;  %v2317_v5 = vor.u32 %v2459_v53, %v2316_v62  ;;  %v114_v20 = vunpack.c.h.bf16 %v30_v59  ;;  %v2364_v47 = vld [vmem:[%s4004_s0 + $0x44] sm:$0xf]  ;;  %v38_v59 = vld [vmem:[%s4006_s2 + $0x9c] sm:$0xff] }
  0x4c   :  { %4041 = vst [vmem:[#allocation8_spill] sm:$0xff] %v3028_v2  ;;  %v3078_v35 = vpack.c.bf16 %v253_v42, %v246_v41  ;;  %v3084_v55 = vpack.c.bf16 %v242_v50, %v235_v49  ;;  %v267_v22 = vmul.f32 %v3009_v48, %v125_v8  ;;  %v248_v25 = vmul.f32 %v3065_v27, %v106_v9  ;;  %v1942_v49 = vld [vmem:[%s4004_s0 + $0x48] sm:$0xf0]  ;;  %v41_v50 = vld [vmem:[%s4006_s2 + $0xb0] sm:$0xff]  ;;  %v2380_v8 = vld [vmem:[%s4004_s0 + $0xc4] sm:$0xf] }
  0x4d   :  { %4043 = vst [vmem:[#allocation10_spill] sm:$0xff] %v3082_v52  ;;  %1529 = vmatpush.bf16.msra.mxu0 %v2017_v46  ;;  %1583 = vmatpush.bf16.msra.mxu1 %v2081_v6  ;;  %v255_v26 = vmul.f32 %v3065_v27, %v113_v14  ;;  %v261_v28 = vmul.f32 %v3012_v54, %v119_v15  ;;  %v132_v60 = vunpack.c.l.bf16 %v41_v50  ;;  %v139_v61 = vunpack.c.l.bf16 %v45_v56  ;;  %v2006_v9 = vld [vmem:[%s4004_s0 + $0xc8] sm:$0xf0]  ;;  %v2396_v14 = vld [vmem:[%s4004_s0 + $0x144] sm:$0xf] }
  0x4e   :  { %1475 = vmatpush.bf16.msra.mxu3 %v1953_v21  ;;  %4044 = vst [vmem:[#allocation11_spill] sm:$0xff] %v3084_v55  ;;  %1423 = vmatpush.bf16.msra.mxu2 %v2317_v5  ;;  %v260_v21 = vmul.f32 %v3009_v48, %v118_v7  ;;  %v268_v29 = vmul.f32 %v3012_v54, %v126_v16  ;;  %v133_v62 = vunpack.c.h.bf16 %v41_v50  ;;  %v120_v46 = vunpack.c.l.bf16 %v34_v58  ;;  %v2457_v50 = vld [vmem:[%s4004_s0 + $0x324] sm:$0xf0] }
  0x4f   :  { %v249_v30 = vmul.f32 %v3068_v40, %v107_v17  ;;  %v256_v41 = vmul.f32 %v3068_v40, %v114_v20  ;;  %v3130_v43 = vpack.c.bf16 %v255_v26, %v248_v25  ;;  %v1945_v57 = vor.u32 %v2364_v47, %v1942_v49  ;;  %v2308_v49 = vld [vmem:[%s4004_s0 + $0x320] sm:$0xf] }
  0x50   :  { %v3128_v42 = vpack.c.bf16 %v267_v22, %v260_v21  ;;  %v3132_v44 = vpack.c.bf16 %v268_v29, %v261_v28  ;;  %v127_v53 = vunpack.c.l.bf16 %v38_v59  ;;  %v140_v3 = vunpack.c.h.bf16 %v45_v56  ;;  %v2070_v21 = vld [vmem:[%s4004_s0 + $0x148] sm:$0xf0] }
  0x51   :  { %4045 = vst [vmem:[#allocation12_spill] sm:$0xff] %v3130_v43  ;;  %v3134_v45 = vpack.c.bf16 %v256_v41, %v249_v30  ;;  %v121_v4 = vunpack.c.h.bf16 %v34_v58  ;;  %v128_v5 = vunpack.c.h.bf16 %v38_v59  ;;  %v274_v6 = vmul.f32 %v3009_v48, %v132_v60  ;;  %v49_v56 = vld [vmem:[%s4006_s2 + $0xe8] sm:$0xff]  ;;  %v42_v58 = vld [vmem:[%s4006_s2 + $0xb8] sm:$0xff] }
  0x52   :  { %4046 = vst [vmem:[#allocation13_spill] sm:$0xff] %v3132_v44  ;;  %1476 = vmatpush.bf16.msra.mxu3 %v1945_v57  ;;  %v281_v7 = vmul.f32 %v3009_v48, %v139_v61  ;;  %v275_v15 = vmul.f32 %v3012_v54, %v133_v62  ;;  %v262_v16 = vmul.f32 %v3065_v27, %v120_v46  ;;  %v53_v57 = vld [vmem:[%s4006_s2 + $0x104] sm:$0xff]  ;;  %v46_v60 = vld [vmem:[%s4006_s2 + $0xd4] sm:$0xff]  ;;  %v1934_v62 = vld [vmem:[%s4004_s0 + $0x38] sm:$0xf0] }
  0x53   :  { %1118 = vmatmul.bf16.gmra.mxu0 %v2960_v10  ;;  %1143 = vmatmul.bf16.gmra.mxu2 %v2962_v11  ;;  %4047 = vst [vmem:[#allocation14_spill] sm:$0xff] %v3134_v45  ;;  %v269_v17 = vmul.f32 %v3065_v27, %v127_v53  ;;  %v2009_v20 = vor.u32 %v2380_v8, %v2006_v9  ;;  %v2362_v61 = vld [vmem:[%s4004_s0 + $0x34] sm:$0xf]  ;;  %v146_v53 = vunpack.c.l.bf16 %v49_v56  ;;  %v135_v8 = vunpack.c.h.bf16 %v42_v58 }
  0x54   :  { %1172 = vmatmul.bf16.gmra.mxu1 %v2964_v12  ;;  %v282_v22 = vmul.f32 %v3012_v54, %v140_v3  ;;  %v263_v25 = vmul.f32 %v3068_v40, %v121_v4  ;;  %v270_v26 = vmul.f32 %v3068_v40, %v128_v5  ;;  %v2073_v28 = vor.u32 %v2396_v14, %v2070_v21 }
  0x55   :  { %1197 = vmatmul.bf16.gmra.mxu3 %v2966_v13  ;;  %1530 = vmatpush.bf16.msra.mxu0 %v2009_v20  ;;  %v3178_v29 = vpack.c.bf16 %v281_v7, %v274_v6  ;;  %v3180_v30 = vpack.c.bf16 %v269_v17, %v262_v16  ;;  %v2309_v59 = vor.u32 %v2457_v50, %v2308_v49  ;;  %v153_v3 = vunpack.c.l.bf16 %v53_v57  ;;  %v2378_v16 = vld [vmem:[%s4004_s0 + $0xb4] sm:$0xf]  ;;  %v1998_v17 = vld [vmem:[%s4004_s0 + $0xb8] sm:$0xf0] }
  0x56   :  { %1584 = vmatpush.bf16.msra.mxu1 %v2073_v28  ;;  %v3182_v41 = vpack.c.bf16 %v282_v22, %v275_v15  ;;  %v3184_v47 = vpack.c.bf16 %v270_v26, %v263_v25  ;;  %v1937_v46 = vor.u32 %v2362_v61, %v1934_v62  ;;  %v147_v4 = vunpack.c.h.bf16 %v49_v56  ;;  %v2394_v20 = vld [vmem:[%s4004_s0 + $0x134] sm:$0xf]  ;;  %v2062_v28 = vld [vmem:[%s4004_s0 + $0x138] sm:$0xf0] }
  0x57   :  { %4048 = vst [vmem:[#allocation15_spill] sm:$0xff] %v3180_v30  ;;  %1424 = vmatpush.bf16.msra.mxu2 %v2309_v59  ;;  %v134_v5 = vunpack.c.l.bf16 %v42_v58  ;;  %v141_v6 = vunpack.c.l.bf16 %v46_v60  ;;  %v154_v7 = vunpack.c.h.bf16 %v53_v57  ;;  %v142_v9 = vunpack.c.h.bf16 %v46_v60 }
  0x58   :  { %4049 = vst [vmem:[#allocation16_spill] sm:$0xff] %v3182_v41  ;;  %1477 = vmatpush.bf16.msra.mxu3 %v1937_v46  ;;  %v288_v14 = vmul.f32 %v3009_v48, %v146_v53  ;;  %v295_v15 = vmul.f32 %v3009_v48, %v153_v3  ;;  %v289_v21 = vmul.f32 %v3012_v54, %v147_v4  ;;  %v57_v3 = vld [vmem:[%s4006_s2 + $0x120] sm:$0xff] }
  0x59   :  { %4050 = vst [vmem:[#allocation17_spill] sm:$0xff] %v3184_v47  ;;  %v276_v22 = vmul.f32 %v3065_v27, %v134_v5  ;;  %v283_v25 = vmul.f32 %v3065_v27, %v141_v6  ;;  %v2001_v26 = vor.u32 %v2378_v16, %v1998_v17  ;;  %v296_v49 = vmul.f32 %v3012_v54, %v154_v7  ;;  %v61_v4 = vld [vmem:[%s4006_s2 + $0x13c] sm:$0xff]  ;;  %v50_v5 = vld [vmem:[%s4006_s2 + $0xf0] sm:$0xff]  ;;  %v2360_v7 = vld [vmem:[%s4004_s0 + $0x24] sm:$0xf] }
  0x5a   :  { %v277_v50 = vmul.f32 %v3068_v40, %v135_v8  ;;  %v284_v56 = vmul.f32 %v3068_v40, %v142_v9  ;;  %v2065_v57 = vor.u32 %v2394_v20, %v2062_v28  ;;  %v3234_v58 = vpack.c.bf16 %v295_v15, %v288_v14  ;;  %v54_v6 = vld [vmem:[%s4006_s2 + $0x10c] sm:$0xff] }
  0x5b   :  { %1531 = vmatpush.bf16.msra.mxu0 %v2001_v26  ;;  %v3236_v59 = vpack.c.bf16 %v283_v25, %v276_v22  ;;  %v3238_v61 = vpack.c.bf16 %v296_v49, %v289_v21  ;;  %v1926_v8 = vld [vmem:[%s4004_s0 + $0x28] sm:$0xf0]  ;;  %v160_v15 = vunpack.c.l.bf16 %v57_v3  ;;  %v167_v16 = vunpack.c.l.bf16 %v61_v4 }
  0x5c   :  { %1585 = vmatpush.bf16.msra.mxu1 %v2065_v57  ;;  %v3240_v62 = vpack.c.bf16 %v284_v56, %v277_v50  ;;  %v1929_v9 = vor.u32 %v2360_v7, %v1926_v8  ;;  %v161_v20 = vunpack.c.h.bf16 %v57_v3  ;;  %v148_v21 = vunpack.c.l.bf16 %v50_v5  ;;  %v2300_v3 = vld [vmem:[%s4004_s0 + $0x310] sm:$0xf]  ;;  %v2455_v7 = vld [vmem:[%s4004_s0 + $0x314] sm:$0xf0] }
  0x5d   :  { %4051 = vst [vmem:[#allocation18_spill] sm:$0xff] %v3236_v59  ;;  %v155_v22 = vunpack.c.l.bf16 %v54_v6  ;;  %v168_v28 = vunpack.c.h.bf16 %v61_v4  ;;  %v149_v49 = vunpack.c.h.bf16 %v50_v5  ;;  %v156_v50 = vunpack.c.h.bf16 %v54_v6  ;;  %v2376_v4 = vld [vmem:[%s4004_s0 + $0xa4] sm:$0xf] }
  0x5e   :  { %4052 = vst [vmem:[#allocation19_spill] sm:$0xff] %v3238_v61  ;;  %1478 = vmatpush.bf16.msra.mxu3 %v1929_v9  ;;  %v303_v5 = vmul.f32 %v3012_v54, %v161_v20  ;;  %v290_v6 = vmul.f32 %v3065_v27, %v148_v21  ;;  %v2301_v9 = vor.u32 %v2455_v7, %v2300_v3 }
  0x5f   :  { %4053 = vst [vmem:[#allocation20_spill] sm:$0xff] %v3240_v62  ;;  %v297_v8 = vmul.f32 %v3065_v27, %v155_v22 }
  0x60   :  { %1425 = vmatpush.bf16.msra.mxu2 %v2301_v9 }
  0x61   :  { %v3292_v21 = vpack.c.bf16 %v297_v8, %v290_v6  ;;  %v58_v6 = vld [vmem:[%s4006_s2 + $0x128] sm:$0xff] }
  0x62   :  { %v62_v8 = vld [vmem:[%s4006_s2 + $0x144] sm:$0xff] }
  0x63   :  { %1123 = vmatmul.bf16.gmra.mxu0 %v3022_v63  ;;  %1211 = vmatmul.bf16.vlgmr.msrb.gmra.mxu2 %v3024_v0  ;;  %4054 = vst [vmem:[#allocation21_spill] sm:$0xff] %v3292_v21 }
  0x64   :  { %1177 = vmatmul.bf16.gmra.mxu1 %v3026_v1 }
  0x65   :  { %1265 = vmatmul.bf16.vlgmr.msrb.gmra.mxu3 %v3028_v2 }
  0x73   :  { %1216 = vmatmul.bf16.gmra.mxu2 %v3078_v35  ;;  %1319 = vmatmul.bf16.vlgmr.msrb.gmra.mxu0 %v3080_v51 }
  0x74   :  { %1373 = vmatmul.bf16.vlgmr.msrb.gmra.mxu1 %v3084_v55 }
  0x75   :  { %1270 = vmatmul.bf16.gmra.mxu3 %v3082_v52 }
  0x83   :  { %1221 = vmatmul.bf16.gmra.mxu2 %v3128_v42  ;;  %1324 = vmatmul.bf16.gmra.mxu0 %v3130_v43 }
  0x84   :  { %1378 = vmatmul.bf16.gmra.mxu1 %v3134_v45 }
  0x85   :  { %1275 = vmatmul.bf16.gmra.mxu3 %v3132_v44 }
  0x93   :  { %1226 = vmatmul.bf16.gmra.mxu2 %v3178_v29  ;;  %1329 = vmatmul.bf16.gmra.mxu0 %v3180_v30 }
  0x94   :  { %1383 = vmatmul.bf16.gmra.mxu1 %v3184_v47 }
  0x95   :  { %1280 = vmatmul.bf16.gmra.mxu3 %v3182_v41 }
  0xa0   :  { %v1104_v60 = vpop.f32.mrf.mxu0 }
  0xa1   :  { %v1158_v46 = vpop.f32.mrf.mxu1 }
  0xa2   :  { %v3242_v53 = vadd.f32 %v1158_v46, %v1104_v60  ;;  %v302_v60 = vmul.f32 %v3009_v48, %v160_v15  ;;  %v309_v46 = vmul.f32 %v3009_v48, %v167_v16  ;;  %v310_v15 = vmul.f32 %v3012_v54, %v168_v28  ;;  %v2392_v28 = vld [vmem:[%s4004_s0 + $0x124] sm:$0xf] }
  0xa3   :  { %1231 = vmatmul.bf16.gmra.mxu2 %v3234_v58  ;;  %1334 = vmatmul.bf16.gmra.mxu0 %v3236_v59  ;;  %v291_v16 = vmul.f32 %v3068_v40, %v149_v49  ;;  %v2054_v49 = vld [vmem:[%s4004_s0 + $0x128] sm:$0xf0] }
  0xa4   :  { %1388 = vmatmul.bf16.gmra.mxu1 %v3240_v62  ;;  %v3290_v62 = vpack.c.bf16 %v309_v46, %v302_v60  ;;  %v3296_v7 = vpack.c.bf16 %v310_v15, %v303_v5  ;;  %v2057_v60 = vor.u32 %v2392_v28, %v2054_v49  ;;  %v69_v5 = vld [vmem:[%s4006_s2 + $0x174] sm:$0xff]  ;;  %v163_v49 = vunpack.c.h.bf16 %v58_v6 }
  0xa5   :  { %1285 = vmatmul.bf16.gmra.mxu3 %v3238_v61  ;;  %v182_v28 = vunpack.c.h.bf16 %v69_v5 }
  0xa6   :  { %v1129_v14 = vpop.f32.mrf.mxu2  ;;  %4055 = vst [vmem:[#allocation22_spill] sm:$0xff] %v3296_v7  ;;  %1586 = vmatpush.bf16.msra.mxu1 %v2057_v60  ;;  %v1918_v60 = vld [vmem:[%s4004_s0 + $0x18] sm:$0xf0]  ;;  %v305_v47 = vmul.f32 %v3068_v40, %v163_v49 }
  0xa8   :  { %v1183_v17 = vpop.f32.mrf.mxu3  ;;  %v1106_v26 = vpop.f32.mrf.mxu0 }
  0xa9   :  { %v3266_v25 = vadd.f32 %v1183_v17, %v1129_v14  ;;  %v1160_v56 = vpop.f32.mrf.mxu1  ;;  %v1990_v14 = vld [vmem:[%s4004_s0 + $0xa8] sm:$0xf0]  ;;  %v298_v17 = vmul.f32 %v3068_v40, %v156_v50 }
  0xaa   :  { %v3268_v57 = vadd.f32 %v1160_v56, %v1106_v26  ;;  %v1993_v26 = vor.u32 %v2376_v4, %v1990_v14  ;;  %v65_v4 = vld [vmem:[%s4006_s2 + $0x158] sm:$0xff] }
  0xab   :  { %v3298_v61 = vpack.c.bf16 %v298_v17, %v291_v16  ;;  %v174_v14 = vunpack.c.l.bf16 %v65_v4  ;;  %v181_v16 = vunpack.c.l.bf16 %v69_v5  ;;  %v175_v17 = vunpack.c.h.bf16 %v65_v4 }
  0xac   :  { %1532 = vmatpush.bf16.msra.mxu0 %v1993_v26  ;;  %v162_v26 = vunpack.c.l.bf16 %v58_v6 }
  0xad   :  { %4056 = vst [vmem:[#allocation23_spill] sm:$0xff] %v3298_v61  ;;  %v316_v4 = vmul.f32 %v3009_v48, %v174_v14 }
  0xae   :  { %v1131_v56 = vpop.f32.mrf.mxu2  ;;  %v304_v5 = vmul.f32 %v3065_v27, %v162_v26 }
  0xb0   :  { %v1185_v20 = vpop.f32.mrf.mxu3  ;;  %v1109_v3 = vpop.f32.mrf.mxu0 }
  0xb1   :  { %v3294_v22 = vadd.f32 %v1185_v20, %v1131_v56  ;;  %v1163_v50 = vpop.f32.mrf.mxu1  ;;  %v169_v56 = vunpack.c.l.bf16 %v62_v8 }
  0xb2   :  { %v3306_v46 = vadd.f32 %v1163_v50, %v1109_v3  ;;  %v170_v50 = vunpack.c.h.bf16 %v62_v8  ;;  %v317_v8 = vmul.f32 %v3012_v54, %v175_v17  ;;  %v2374_v17 = vld [vmem:[%s4004_s0 + $0x94] sm:$0xf] }
  0xb3   :  { %1236 = vmatmul.bf16.gmra.mxu2 %v3290_v62  ;;  %1339 = vmatmul.bf16.gmra.mxu0 %v3292_v21  ;;  %v311_v6 = vmul.f32 %v3065_v27, %v169_v56  ;;  %v1982_v56 = vld [vmem:[%s4004_s0 + $0x98] sm:$0xf0] }
  0xb4   :  { %1393 = vmatmul.bf16.gmra.mxu1 %v3298_v61  ;;  %v2358_v61 = vld [vmem:[%s4004_s0 + $0x14] sm:$0xf]  ;;  %v312_v41 = vmul.f32 %v3068_v40, %v170_v50  ;;  %v1985_v49 = vor.u32 %v2374_v17, %v1982_v56 }
  0xb5   :  { %1290 = vmatmul.bf16.gmra.mxu3 %v3296_v7  ;;  %v1921_v21 = vor.u32 %v2358_v61, %v1918_v60  ;;  %v3344_v14 = vpack.c.bf16 %v311_v6, %v304_v5  ;;  %v2046_v6 = vld [vmem:[%s4004_s0 + $0x118] sm:$0xf0] }
  0xb6   :  { %v1134_v9 = vpop.f32.mrf.mxu2  ;;  %1533 = vmatpush.bf16.msra.mxu0 %v1985_v49 }
  0xb7   :  { %1479 = vmatpush.bf16.msra.mxu3 %v1921_v21  ;;  %4057 = vst [vmem:[#allocation24_spill] sm:$0xff] %v3344_v14  ;;  %v3350_v21 = vpack.c.bf16 %v312_v41, %v305_v47  ;;  %v2453_v41 = vld [vmem:[%s4004_s0 + $0x304] sm:$0xf0]  ;;  %v2390_v47 = vld [vmem:[%s4004_s0 + $0x114] sm:$0xf] }
  0xb8   :  { %v1188_v15 = vpop.f32.mrf.mxu3  ;;  %v1111_v3 = vpop.f32.mrf.mxu0 }
  0xb9   :  { %v3324_v20 = vadd.f32 %v1188_v15, %v1134_v9  ;;  %v1165_v7 = vpop.f32.mrf.mxu1  ;;  %v323_v9 = vmul.f32 %v3009_v48, %v181_v16  ;;  %v324_v15 = vmul.f32 %v3012_v54, %v182_v28  ;;  %4059 = vst [vmem:[#allocation26_spill] sm:$0xff] %v3350_v21 }
  0xba   :  { %v3332_v59 = vadd.f32 %v1165_v7, %v1111_v3 }
  0xbb   :  { %v3342_v3 = vpack.c.bf16 %v323_v9, %v316_v4  ;;  %v3348_v60 = vpack.c.bf16 %v324_v15, %v317_v8  ;;  %v2292_v4 = vld [vmem:[%s4004_s0 + $0x300] sm:$0xf]  ;;  %v73_v9 = vld [vmem:[%s4006_s2 + $0x190] sm:$0xff] }
  0xbc   :  { %v2293_v5 = vor.u32 %v2453_v41, %v2292_v4  ;;  %v77_v8 = vld [vmem:[%s4006_s2 + $0x1ac] sm:$0xff]  ;;  %v66_v15 = vld [vmem:[%s4006_s2 + $0x160] sm:$0xff]  ;;  %v188_v17 = vunpack.c.l.bf16 %v73_v9  ;;  %v189_v4 = vunpack.c.h.bf16 %v73_v9 }
  0xbd   :  { %4058 = vst [vmem:[#allocation25_spill] sm:$0xff] %v3348_v60  ;;  %v176_v41 = vunpack.c.l.bf16 %v66_v15  ;;  %v196_v30 = vunpack.c.h.bf16 %v77_v8  ;;  %v177_v45 = vunpack.c.h.bf16 %v66_v15  ;;  %v1910_v9 = vld [vmem:[%s4004_s0 + $0x8] sm:$0xf0] }
  0xbe   :  { %v1136_v61 = vpop.f32.mrf.mxu2  ;;  %1426 = vmatpush.bf16.msra.mxu2 %v2293_v5  ;;  %v330_v49 = vmul.f32 %v3009_v48, %v188_v17 }
  0xc0   :  { %v1190_v7 = vpop.f32.mrf.mxu3  ;;  %v1114_v26 = vpop.f32.mrf.mxu0 }
  0xc1   :  { %v3346_v16 = vadd.f32 %v1190_v7, %v1136_v61  ;;  %v1168_v28 = vpop.f32.mrf.mxu1  ;;  %v70_v61 = vld [vmem:[%s4006_s2 + $0x17c] sm:$0xff]  ;;  %v2049_v7 = vor.u32 %v2390_v47, %v2046_v6  ;;  %v2356_v47 = vld [vmem:[%s4004_s0 + $0x4] sm:$0xf]  ;;  %v318_v6 = vmul.f32 %v3065_v27, %v176_v41 }
  0xc2   :  { %v3358_v50 = vadd.f32 %v1168_v28, %v1114_v26  ;;  %v195_v28 = vunpack.c.l.bf16 %v77_v8  ;;  %v184_v44 = vunpack.c.h.bf16 %v70_v61  ;;  %v1913_v15 = vor.u32 %v2356_v47, %v1910_v9  ;;  %v2372_v9 = vld [vmem:[%s4004_s0 + $0x84] sm:$0xf] }
  0xc3   :  { %1241 = vmatmul.bf16.gmra.mxu2 %v3342_v3  ;;  %1344 = vmatmul.bf16.gmra.mxu0 %v3344_v14 }
  0xc4   :  { %1398 = vmatmul.bf16.gmra.mxu1 %v3350_v21  ;;  %v183_v21 = vunpack.c.l.bf16 %v70_v61  ;;  %v337_v5 = vmul.f32 %v3009_v48, %v195_v28  ;;  %v319_v61 = vmul.f32 %v3068_v40, %v177_v45  ;;  %1480 = vmatpush.bf16.msra.mxu3 %v1913_v15  ;;  %v85_v45 = vld [vmem:[%s4006_s2 + $0x1e4] sm:$0xff] }
  0xc5   :  { %1295 = vmatmul.bf16.gmra.mxu3 %v3348_v60  ;;  %1587 = vmatpush.bf16.msra.mxu1 %v2049_v7  ;;  %v326_v7 = vmul.f32 %v3068_v40, %v184_v44  ;;  %v81_v44 = vld [vmem:[%s4006_s2 + $0x1c8] sm:$0xff]  ;;  %v2388_v15 = vld [vmem:[%s4004_s0 + $0x104] sm:$0xf] }
  0xc6   :  { %v1139_v26 = vpop.f32.mrf.mxu2  ;;  %v325_v8 = vmul.f32 %v3065_v27, %v183_v21 }
  0xc7   :  { %v3414_v47 = vpack.c.bf16 %v326_v7, %v319_v61  ;;  %v202_v7 = vunpack.c.l.bf16 %v81_v44 }
  0xc8   :  { %v1193_v56 = vpop.f32.mrf.mxu3  ;;  %v1116_v14 = vpop.f32.mrf.mxu0  ;;  %v3408_v52 = vpack.c.bf16 %v325_v8, %v318_v6  ;;  %v78_v6 = vld [vmem:[%s4006_s2 + $0x1b4] sm:$0xff] }
  0xc9   :  { %v3388_v60 = vadd.f32 %v1193_v56, %v1139_v26  ;;  %v1170_v43 = vpop.f32.mrf.mxu1  ;;  %v3406_v56 = vpack.c.bf16 %v337_v5, %v330_v49  ;;  %4063 = vst [vmem:[#allocation30_spill] sm:$0xff] %v3414_v47  ;;  %v74_v49 = vld [vmem:[%s4006_s2 + $0x198] sm:$0xff]  ;;  %v1974_v5 = vld [vmem:[%s4004_s0 + $0x88] sm:$0xf0]  ;;  %v198_v51 = vunpack.c.h.bf16 %v78_v6 }
  0xca   :  { %v3390_v55 = vadd.f32 %v1170_v43, %v1116_v14  ;;  %v331_v43 = vmul.f32 %v3012_v54, %v189_v4  ;;  %v338_v14 = vmul.f32 %v3012_v54, %v196_v30  ;;  %4061 = vst [vmem:[#allocation28_spill] sm:$0xff] %v3408_v52  ;;  %v1977_v8 = vor.u32 %v2372_v9, %v1974_v5 }
  0xcb   :  { %4060 = vst [vmem:[#allocation27_spill] sm:$0xff] %v3406_v56  ;;  %v210_v5 = vunpack.c.h.bf16 %v85_v45 }
  0xcc   :  { %v3412_v21 = vpack.c.bf16 %v338_v14, %v331_v43  ;;  %v2038_v43 = vld [vmem:[%s4004_s0 + $0x108] sm:$0xf0]  ;;  %1534 = vmatpush.bf16.msra.mxu0 %v1977_v8 }
  0xcd   :  { %v2041_v14 = vor.u32 %v2388_v15, %v2038_v43  ;;  %v344_v15 = vmul.f32 %v3009_v48, %v202_v7 }
  0xce   :  { %v1141_v26 = vpop.f32.mrf.mxu2  ;;  %4062 = vst [vmem:[#allocation29_spill] sm:$0xff] %v3412_v21 }
  0xcf   :  { %1588 = vmatpush.bf16.msra.mxu1 %v2041_v14  ;;  %v2418_v14 = vld [vmem:[%s4004_s0 + $0x1f4] sm:$0xf] }
  0xd0   :  { %v1195_v17 = vpop.f32.mrf.mxu3  ;;  %v1119_v41 = vpop.f32.mrf.mxu0 }
  0xd1   :  { %v3410_v28 = vadd.f32 %v1195_v17, %v1141_v26  ;;  %v1173_v4 = vpop.f32.mrf.mxu1  ;;  %v209_v17 = vunpack.c.l.bf16 %v85_v45  ;;  %v2158_v45 = vld [vmem:[%s4004_s0 + $0x1f8] sm:$0xf0] }
  0xd2   :  { %v3416_v30 = vadd.f32 %v1173_v4, %v1119_v41  ;;  %v203_v41 = vunpack.c.h.bf16 %v81_v44  ;;  %v190_v4 = vunpack.c.l.bf16 %v74_v49 }
  0xd3   :  { %1246 = vmatmul.bf16.gmra.mxu2 %v3406_v56  ;;  %1349 = vmatmul.bf16.gmra.mxu0 %v3408_v52  ;;  %v191_v52 = vunpack.c.h.bf16 %v74_v49  ;;  %v351_v43 = vmul.f32 %v3009_v48, %v209_v17  ;;  %v352_v48 = vmul.f32 %v3012_v54, %v210_v5 }
  0xd4   :  { %1403 = vmatmul.bf16.gmra.mxu1 %v3414_v47  ;;  %v197_v47 = vunpack.c.l.bf16 %v78_v6  ;;  %v345_v8 = vmul.f32 %v3012_v54, %v203_v41  ;;  %v332_v44 = vmul.f32 %v3065_v27, %v190_v4  ;;  %v340_v6 = vmul.f32 %v3068_v40, %v198_v51 }
  0xd5   :  { %1300 = vmatmul.bf16.gmra.mxu3 %v3412_v21  ;;  %v333_v49 = vmul.f32 %v3068_v40, %v191_v52  ;;  %v3470_v41 = vpack.c.bf16 %v351_v43, %v344_v15  ;;  %v19_v15 = vld [vmem:[%s4006_s2 + $0x18] sm:$0xf]  ;;  %v23_v43 = vld [vmem:[%s4006_s2 + $0x34] sm:$0xf] }
  0xd6   :  { %v1144_v61 = vpop.f32.mrf.mxu2  ;;  %v339_v56 = vmul.f32 %v3065_v27, %v197_v47  ;;  %v2222_v47 = vld [vmem:[%s4004_s0 + $0x278] sm:$0xf0]  ;;  %v3476_v52 = vpack.c.bf16 %v352_v48, %v345_v8  ;;  %v2450_v8 = vld [vmem:[%s4004_s0 + $0x2f4] sm:$0xf] }
  0xd7   :  { %4064 = vst [vmem:[#allocation31_spill] sm:$0xff] %v3470_v41  ;;  %v3478_v51 = vpack.c.bf16 %v340_v6, %v333_v49  ;;  %v2334_v49 = vld [vmem:[%s4004_s0 + $0x358] sm:$0xf0] }
  0xd8   :  { %v1198_v26 = vpop.f32.mrf.mxu3  ;;  %v1121_v9 = vpop.f32.mrf.mxu0  ;;  %v3472_v4 = vpack.c.bf16 %v339_v56, %v332_v44  ;;  %4066 = vst [vmem:[#allocation33_spill] sm:$0xff] %v3476_v52  ;;  %v86_v56 = vld [vmem:[%s4006_s2 + $0x1ec] sm:$0xff]  ;;  %v2286_v44 = vld [vmem:[%s4004_s0 + $0x2f8] sm:$0xf0] }
  0xd9   :  { %v3446_v21 = vadd.f32 %v1198_v26, %v1144_v61  ;;  %v1175_v2 = vpop.f32.mrf.mxu1  ;;  %v2161_v61 = vor.u32 %v2418_v14, %v2158_v45  ;;  %4067 = vst [vmem:[#allocation34_spill] sm:$0xff] %v3478_v51  ;;  %v82_v45 = vld [vmem:[%s4006_s2 + $0x1d0] sm:$0xff]  ;;  %v2289_v48 = vor.u32 %v2450_v8, %v2286_v44 }
  0xda   :  { %v3448_v13 = vadd.f32 %v1175_v2, %v1121_v9  ;;  %v2434_v2 = vld [vmem:[%s4004_s0 + $0x274] sm:$0xf]  ;;  %4065 = vst [vmem:[#allocation32_spill] sm:$0xff] %v3472_v4  ;;  %v205_v44 = vunpack.c.h.bf16 %v82_v45 }
  0xdb   :  { %v2225_v7 = vor.u32 %v2434_v2, %v2222_v47  ;;  %1635 = vmatpush.bf16.msrb.mxu2 %v2161_v61  ;;  %v2462_v2 = vld [vmem:[%s4004_s0 + $0x354] sm:$0xf]  ;;  %v204_v61 = vunpack.c.l.bf16 %v82_v45  ;;  %v211_v47 = vunpack.c.l.bf16 %v86_v56  ;;  %1743 = vmatpush.bf16.msrb.mxu0 %v2289_v48  ;;  %v2150_v45 = vld [vmem:[%s4004_s0 + $0x1e8] sm:$0xf0] }
  0xdd   :  { %1689 = vmatpush.bf16.msrb.mxu3 %v2225_v7  ;;  %v2337_v7 = vor.u32 %v2462_v2, %v2334_v49  ;;  %v2214_v49 = vld [vmem:[%s4004_s0 + $0x268] sm:$0xf0] }
  0xde   :  { %v1146_v26 = vpop.f32.mrf.mxu2 }
  0xdf   :  { %1799 = vmatpush.bf16.msrb.mxu1 %v2337_v7 }
  0xe0   :  { %v1200_v17 = vpop.f32.mrf.mxu3  ;;  %v1124_v54 = vpop.f32.mrf.mxu0 }
  0xe1   :  { %v3474_v9 = vadd.f32 %v1200_v17, %v1146_v26  ;;  %v1178_v5 = vpop.f32.mrf.mxu1 }
  0xe2   :  { %v3480_v14 = vadd.f32 %v1178_v5, %v1124_v54  ;;  %v94_v54 = vunpack.c.l.bf16 %v19_v15  ;;  %v101_v5 = vunpack.c.l.bf16 %v23_v43  ;;  %v353_v15 = vmul.f32 %v3065_v27, %v211_v47 }
  0xe3   :  { %1251 = vmatmul.bf16.gmra.mxu2 %v3470_v41  ;;  %1354 = vmatmul.bf16.gmra.mxu0 %v3472_v4  ;;  %v212_v4 = vunpack.c.h.bf16 %v86_v56  ;;  %v347_v56 = vmul.f32 %v3068_v40, %v205_v44 }
  0xe4   :  { %1408 = vmatmul.bf16.gmra.mxu1 %v3478_v51  ;;  %v2483_v51 = vld [vmem:[%s4005_s1] sm:$0x7f]  ;;  %s2512_s1 = smov 16  }
  0xe5   :  { %1305 = vmatmul.bf16.gmra.mxu3 %v3476_v52  ;;  %v3514_v52 = vperm.slane %v2483_v51, 6  ;;  %v2416_v51 = vld [vmem:[%s4004_s0 + $0x1e4] sm:$0xf] }
  0xe6   :  { %v1212_v6 = vpop.f32.mrf.mxu2  ;;  %v2153_v48 = vor.u32 %v2416_v51, %v2150_v45 }
  0xe7   :  { %v1213_v26 = vadd.f32 %v1212_v6, %v3242_v53  ;;  %v346_v53 = vmul.f32 %v3065_v27, %v204_v61  ;;  %v236_v43 = vmul.f32 %v3514_v52, %v94_v54  ;;  %v243_v2 = vmul.f32 %v3514_v52, %v101_v5 }
  0xe8   :  { %v1266_v17 = vpop.f32.mrf.mxu3  ;;  %v1126_v8 = vpop.f32.mrf.mxu0  ;;  %v354_v27 = vmul.f32 %v3068_v40, %v212_v4  ;;  %1636 = vmatpush.bf16.msrb.mxu2 %v2153_v48 }
  0xe9   :  { %v1267_v41 = vadd.f32 %v1266_v17, %v1213_v26  ;;  %v1180_v11 = vpop.f32.mrf.mxu1  ;;  %v3537_v26 = vpack.c.bf16 %v353_v15, %v346_v53  ;;  %v3539_v17 = vpack.c.bf16 %v243_v2, %v236_v43  ;;  %v2448_v53 = vld [vmem:[%s4004_s0 + $0x2e4] sm:$0xf]  ;;  %v2278_v15 = vld [vmem:[%s4004_s0 + $0x2e8] sm:$0xf0] }
  0xea   :  { %v3516_v39 = vadd.f32 %v1180_v11, %v1126_v8  ;;  %v2432_v11 = vld [vmem:[%s4004_s0 + $0x264] sm:$0xf]  ;;  %v3541_v5 = vpack.c.bf16 %v354_v27, %v347_v56  ;;  %v2281_v43 = vor.u32 %v2448_v53, %v2278_v15 }
  0xeb   :  { %v2217_v6 = vor.u32 %v2432_v11, %v2214_v49 }
  0xec   :  { %1744 = vmatpush.bf16.msrb.mxu0 %v2281_v43 }
  0xed   :  { %1690 = vmatpush.bf16.msrb.mxu3 %v2217_v6 }
  0xee   :  { %v1214_v61 = vpop.f32.mrf.mxu2 }
  0xef   :  { %v1215_v47 = vadd.f32 %v1214_v61, %v3268_v57  ;;  %v27_v57 = vld [vmem:[%s4006_s2 + $0x50] sm:$0xf] }
  0xf0   :  { %v1268_v7 = vpop.f32.mrf.mxu3  ;;  %v1320_v54 = vpop.f32.mrf.mxu0  ;;  %v108_v11 = vunpack.c.l.bf16 %v27_v57 }
  0xf1   :  { %v1269_v40 = vadd.f32 %v1268_v7, %v1215_v47  ;;  %v1321_v4 = vadd.f32 %v1320_v54, %v1267_v41  ;;  %v1374_v8 = vpop.f32.mrf.mxu1  ;;  %v31_v41 = vld [vmem:[%s4006_s2 + $0x6c] sm:$0xf]  ;;  %v2414_v7 = vld [vmem:[%s4004_s0 + $0x1d4] sm:$0xf]  ;;  %v2460_v54 = vld [vmem:[%s4004_s0 + $0x344] sm:$0xf] }
  0xf2   :  { %v115_v56 = vunpack.c.l.bf16 %v31_v41  ;;  %v250_v61 = vmul.f32 %v3514_v52, %v108_v11  ;;  %v2430_v11 = vld [vmem:[%s4004_s0 + $0x254] sm:$0xf] }
  0xf3   :  { %v3543_v44 = vadd.f32 %v1374_v8, %v1321_v4  ;;  %1359 = vmatmul.bf16.gmra.mxu0 %v3537_v26  ;;  %2338 = vmatmul.msk.bf16.vlgmr.msra.gmra.mxu2 %vm1067_vm0, %v3539_v17  ;;  %v2326_v4 = vld [vmem:[%s4004_s0 + $0x348] sm:$0xf0] }
  0xf4   :  { %1413 = vmatmul.bf16.gmra.mxu1 %v3541_v5  ;;  %v257_v47 = vmul.f32 %v3514_v52, %v115_v56  ;;  %v2329_v8 = vor.u32 %v2460_v54, %v2326_v4  ;;  %v2206_v56 = vld [vmem:[%s4004_s0 + $0x258] sm:$0xf0] }
  0xf5   :  { %1481 = vmatmul.bf16.vlgmr.msra.gmra.mxu3 %v2687_v18  ;;  %v2270_v4 = vld [vmem:[%s4004_s0 + $0x2d8] sm:$0xf0] }
  0xf6   :  { %v1217_v2 = vpop.f32.mrf.mxu2  ;;  %v3580_v15 = vpack.c.bf16 %v257_v47, %v250_v61  ;;  %1800 = vmatpush.bf16.msrb.mxu1 %v2329_v8 }
  0xf7   :  { %v1218_v51 = vadd.f32 %v1217_v2, %v3306_v46  ;;  %v2142_v46 = vld [vmem:[%s4004_s0 + $0x1d8] sm:$0xf0] }
  0xf8   :  { %v1271_v45 = vpop.f32.mrf.mxu3  ;;  %v1322_v18 = vpop.f32.mrf.mxu0 }
  0xf9   :  { %v1272_v27 = vadd.f32 %v1271_v45, %v1218_v51  ;;  %v1323_v48 = vadd.f32 %v1322_v18, %v1269_v40  ;;  %v1376_v49 = vpop.f32.mrf.mxu1  ;;  %v2145_v40 = vor.u32 %v2414_v7, %v2142_v46  ;;  %v2209_v18 = vor.u32 %v2430_v11, %v2206_v56 }
  0xfb   :  { %v3563_v6 = vadd.f32 %v1376_v49, %v1323_v48  ;;  %1637 = vmatpush.bf16.msrb.mxu2 %v2145_v40  ;;  %1691 = vmatpush.bf16.msrb.mxu3 %v2209_v18 }
  0xfe   :  { %v1219_v57 = vpop.f32.mrf.mxu2 }
  0xff   :  { %v1220_v41 = vadd.f32 %v1219_v57, %v3332_v59  ;;  %v35_v59 = vld [vmem:[%s4006_s2 + $0x88] sm:$0xf] }
 0x100   :  { %v1273_v53 = vpop.f32.mrf.mxu3  ;;  %v1325_v43 = vpop.f32.mrf.mxu0  ;;  %v122_v7 = vunpack.c.l.bf16 %v35_v59  ;;  %v2412_v59 = vld [vmem:[%s4004_s0 + $0x1c4] sm:$0xf] }
 0x101   :  { %v1274_v2 = vadd.f32 %v1273_v53, %v1220_v41  ;;  %v1326_v51 = vadd.f32 %v1325_v43, %v1272_v27  ;;  %v1379_v45 = vpop.f32.mrf.mxu1  ;;  %v39_v27 = vld [vmem:[%s4006_s2 + $0xa4] sm:$0xf] }
 0x102   :  { %v129_v46 = vunpack.c.l.bf16 %v39_v27  ;;  %v2134_v27 = vld [vmem:[%s4004_s0 + $0x1c8] sm:$0xf0] }
 0x103   :  { %v3588_v48 = vadd.f32 %v1379_v45, %v1326_v51  ;;  %2339 = vmatmul.msk.bf16.gmra.mxu2 %vm1067_vm0, %v3580_v15  ;;  %1535 = vmatmul.bf16.vlgmr.msra.gmra.mxu0 %v2700_v23 }
 0x104   :  { %1589 = vmatmul.bf16.vlgmr.msra.gmra.mxu1 %v3024_v0  ;;  %v2446_v0 = vld [vmem:[%s4004_s0 + $0x2d4] sm:$0xf]  ;;  %v271_v41 = vmul.f32 %v3514_v52, %v129_v46 }
 0x105   :  { %1486 = vmatmul.bf16.gmra.mxu3 %v2812_v32  ;;  %v2273_v8 = vor.u32 %v2446_v0, %v2270_v4 }
 0x106   :  { %v1222_v49 = vpop.f32.mrf.mxu2 }
 0x107   :  { %v1223_v61 = vadd.f32 %v1222_v49, %v3358_v50  ;;  %v264_v50 = vmul.f32 %v3514_v52, %v122_v7  ;;  %1745 = vmatpush.bf16.msrb.mxu0 %v2273_v8  ;;  %v2137_v49 = vor.u32 %v2412_v59, %v2134_v27  ;;  %v2198_v7 = vld [vmem:[%s4004_s0 + $0x248] sm:$0xf0] }
 0x108   :  { %v1276_v47 = vpop.f32.mrf.mxu3  ;;  %v1327_v23 = vpop.f32.mrf.mxu0 }
 0x109   :  { %v1277_v54 = vadd.f32 %v1276_v47, %v1223_v61  ;;  %v1328_v32 = vadd.f32 %v1327_v23, %v1274_v2  ;;  %v1381_v40 = vpop.f32.mrf.mxu1  ;;  %v3613_v51 = vpack.c.bf16 %v271_v41, %v264_v50  ;;  %v2428_v47 = vld [vmem:[%s4004_s0 + $0x244] sm:$0xf]  ;;  %v2458_v23 = vld [vmem:[%s4004_s0 + $0x334] sm:$0xf]  ;;  %1638 = vmatpush.bf16.msrb.mxu2 %v2137_v49 }
 0x10a   :  { %v2201_v46 = vor.u32 %v2428_v47, %v2198_v7 }
 0x10b   :  { %v3608_v57 = vadd.f32 %v1381_v40, %v1328_v32 }
 0x10c   :  { %1692 = vmatpush.bf16.msrb.mxu3 %v2201_v46 }
 0x10e   :  { %v1224_v53 = vpop.f32.mrf.mxu2 }
 0x10f   :  { %v1225_v43 = vadd.f32 %v1224_v53, %v3390_v55  ;;  %v43_v55 = vld [vmem:[%s4006_s2 + $0xc0] sm:$0xf] }
 0x110   :  { %v1278_v2 = vpop.f32.mrf.mxu3  ;;  %v1330_v45 = vpop.f32.mrf.mxu0  ;;  %v136_v0 = vunpack.c.l.bf16 %v43_v55 }
 0x111   :  { %v1279_v11 = vadd.f32 %v1278_v2, %v1225_v43  ;;  %v1331_v56 = vadd.f32 %v1330_v45, %v1277_v54  ;;  %v1384_v18 = vpop.f32.mrf.mxu1  ;;  %v2318_v54 = vld [vmem:[%s4004_s0 + $0x338] sm:$0xf0] }
 0x112   :  { %v2321_v32 = vor.u32 %v2458_v23, %v2318_v54  ;;  %v278_v2 = vmul.f32 %v3514_v52, %v136_v0  ;;  %v51_v23 = vld [vmem:[%s4006_s2 + $0xf8] sm:$0xf]  ;;  %v2126_v54 = vld [vmem:[%s4004_s0 + $0x1b8] sm:$0xf0] }
 0x113   :  { %v3621_v61 = vadd.f32 %v1384_v18, %v1331_v56  ;;  %2340 = vmatmul.msk.bf16.gmra.mxu2 %vm1067_vm0, %v3613_v51  ;;  %1540 = vmatmul.bf16.gmra.mxu0 %v2816_v34  ;;  %v47_v34 = vld [vmem:[%s4006_s2 + $0xdc] sm:$0xf]  ;;  %v2444_v56 = vld [vmem:[%s4004_s0 + $0x2c4] sm:$0xf] }
 0x114   :  { %1594 = vmatmul.bf16.gmra.mxu1 %v3078_v35  ;;  %v143_v4 = vunpack.c.l.bf16 %v47_v34 }
 0x115   :  { %1491 = vmatmul.bf16.gmra.mxu3 %v2904_v31  ;;  %1801 = vmatpush.bf16.msrb.mxu1 %v2321_v32 }
 0x116   :  { %v1227_v40 = vpop.f32.mrf.mxu2  ;;  %v285_v45 = vmul.f32 %v3514_v52, %v143_v4 }
 0x117   :  { %v1228_v31 = vadd.f32 %v1227_v40, %v3416_v30  ;;  %v2262_v30 = vld [vmem:[%s4004_s0 + $0x2c8] sm:$0xf0]  ;;  %v2426_v40 = vld [vmem:[%s4004_s0 + $0x234] sm:$0xf] }
 0x118   :  { %v1281_v35 = vpop.f32.mrf.mxu3  ;;  %v1332_v8 = vpop.f32.mrf.mxu0  ;;  %v2265_v18 = vor.u32 %v2444_v56, %v2262_v30  ;;  %v3658_v49 = vpack.c.bf16 %v285_v45, %v278_v2 }
 0x119   :  { %v1282_v50 = vadd.f32 %v1281_v35, %v1228_v31  ;;  %v1333_v41 = vadd.f32 %v1332_v8, %v1279_v11  ;;  %v1386_v53 = vpop.f32.mrf.mxu1  ;;  %v2190_v31 = vld [vmem:[%s4004_s0 + $0x238] sm:$0xf0] }
 0x11a   :  { %1746 = vmatpush.bf16.msrb.mxu0 %v2265_v18  ;;  %v2193_v35 = vor.u32 %v2426_v40, %v2190_v31  ;;  %v2442_v18 = vld [vmem:[%s4004_s0 + $0x2b4] sm:$0xf]  ;;  %v59_v31 = vld [vmem:[%s4006_s2 + $0x130] sm:$0xf] }
 0x11b   :  { %v3647_v43 = vadd.f32 %v1386_v53, %v1333_v41 }
 0x11c   :  { %1693 = vmatpush.bf16.msrb.mxu3 %v2193_v35  ;;  %v2408_v35 = vld [vmem:[%s4004_s0 + $0x1a4] sm:$0xf] }
 0x11e   :  { %v1229_v59 = vpop.f32.mrf.mxu2 }
 0x11f   :  { %v1230_v11 = vadd.f32 %v1229_v59, %v3448_v13  ;;  %v2410_v13 = vld [vmem:[%s4004_s0 + $0x1b4] sm:$0xf]  ;;  %v2456_v59 = vld [vmem:[%s4004_s0 + $0x324] sm:$0xf] }
 0x120   :  { %v1283_v27 = vpop.f32.mrf.mxu3  ;;  %v1335_v55 = vpop.f32.mrf.mxu0  ;;  %v2129_v32 = vor.u32 %v2410_v13, %v2126_v54 }
 0x121   :  { %v1284_v47 = vadd.f32 %v1283_v27, %v1230_v11  ;;  %v1336_v7 = vadd.f32 %v1335_v55, %v1282_v50  ;;  %v1389_v34 = vpop.f32.mrf.mxu1  ;;  %v2310_v27 = vld [vmem:[%s4004_s0 + $0x328] sm:$0xf0] }
 0x122   :  { %1639 = vmatpush.bf16.msrb.mxu2 %v2129_v32  ;;  %v2313_v55 = vor.u32 %v2456_v59, %v2310_v27 }
 0x123   :  { %v3660_v46 = vadd.f32 %v1389_v34, %v1336_v7  ;;  %2341 = vmatmul.msk.bf16.gmra.mxu2 %vm1067_vm0, %v3658_v49  ;;  %1545 = vmatmul.bf16.gmra.mxu0 %v2908_v38  ;;  %v55_v38 = vld [vmem:[%s4006_s2 + $0x114] sm:$0xf] }
 0x124   :  { %1599 = vmatmul.bf16.gmra.mxu1 %v3128_v42  ;;  %v150_v42 = vunpack.c.l.bf16 %v51_v23  ;;  %v157_v8 = vunpack.c.l.bf16 %v55_v38 }
 0x125   :  { %1496 = vmatmul.bf16.gmra.mxu3 %v2960_v10  ;;  %1802 = vmatpush.bf16.msrb.mxu1 %v2313_v55 }
 0x126   :  { %v1232_v0 = vpop.f32.mrf.mxu2  ;;  %v292_v56 = vmul.f32 %v3514_v52, %v150_v42  ;;  %v299_v30 = vmul.f32 %v3514_v52, %v157_v8 }
 0x127   :  { %v1233_v10 = vadd.f32 %v1232_v0, %v3480_v14  ;;  %v2254_v14 = vld [vmem:[%s4004_s0 + $0x2b8] sm:$0xf0]  ;;  %v2424_v0 = vld [vmem:[%s4004_s0 + $0x224] sm:$0xf] }
 0x128   :  { %v1286_v4 = vpop.f32.mrf.mxu3  ;;  %v1337_v50 = vpop.f32.mrf.mxu0  ;;  %v2257_v11 = vor.u32 %v2442_v18, %v2254_v14  ;;  %v3703_v23 = vpack.c.bf16 %v299_v30, %v292_v56 }
 0x129   :  { %v1287_v41 = vadd.f32 %v1286_v4, %v1233_v10  ;;  %v1338_v53 = vadd.f32 %v1337_v50, %v1284_v47  ;;  %v1391_v2 = vpop.f32.mrf.mxu1  ;;  %v2182_v4 = vld [vmem:[%s4004_s0 + $0x228] sm:$0xf0]  ;;  %v164_v50 = vunpack.c.l.bf16 %v59_v31 }
 0x12a   :  { %1747 = vmatpush.bf16.msrb.mxu0 %v2257_v11  ;;  %v2185_v42 = vor.u32 %v2424_v0, %v2182_v4  ;;  %v2440_v11 = vld [vmem:[%s4004_s0 + $0x2a4] sm:$0xf] }
 0x12b   :  { %v3686_v45 = vadd.f32 %v1391_v2, %v1338_v53  ;;  %v306_v14 = vmul.f32 %v3514_v52, %v164_v50 }
 0x12c   :  { %1694 = vmatpush.bf16.msrb.mxu3 %v2185_v42 }
 0x12e   :  { %v1234_v47 = vpop.f32.mrf.mxu2 }
 0x12f   :  { %v1235_v7 = vadd.f32 %v1234_v47, %v3516_v39  ;;  %v63_v39 = vld [vmem:[%s4006_s2 + $0x14c] sm:$0xf] }
 0x130   :  { %v1288_v34 = vpop.f32.mrf.mxu3  ;;  %v1340_v13 = vpop.f32.mrf.mxu0 }
 0x131   :  { %v1289_v54 = vadd.f32 %v1288_v34, %v1235_v7  ;;  %v1341_v38 = vadd.f32 %v1340_v13, %v1287_v41  ;;  %v1394_v32 = vpop.f32.mrf.mxu1  ;;  %v171_v41 = vunpack.c.l.bf16 %v63_v39  ;;  %v67_v39 = vld [vmem:[%s4006_s2 + $0x168] sm:$0xf] }
 0x132   :  { %v178_v42 = vunpack.c.l.bf16 %v67_v39 }
 0x133   :  { %v3705_v40 = vadd.f32 %v1394_v32, %v1341_v38  ;;  %2342 = vmatmul.msk.bf16.gmra.mxu2 %vm1067_vm0, %v3703_v23  ;;  %1550 = vmatmul.bf16.gmra.mxu0 %v2964_v12  ;;  %v2118_v12 = vld [vmem:[%s4004_s0 + $0x1a8] sm:$0xf0]  ;;  %v313_v59 = vmul.f32 %v3514_v52, %v171_v41 }
 0x134   :  { %1604 = vmatmul.bf16.gmra.mxu1 %v3178_v29  ;;  %v2121_v10 = vor.u32 %v2408_v35, %v2118_v12  ;;  %v2406_v35 = vld [vmem:[%s4004_s0 + $0x194] sm:$0xf] }
 0x135   :  { %1501 = vmatmul.bf16.gmra.mxu3 %v3022_v63  ;;  %v3742_v34 = vpack.c.bf16 %v313_v59, %v306_v14  ;;  %v2454_v12 = vld [vmem:[%s4004_s0 + $0x314] sm:$0xf] }
 0x136   :  { %v1237_v63 = vpop.f32.mrf.mxu2  ;;  %1640 = vmatpush.bf16.msrb.mxu2 %v2121_v10  ;;  %v2302_v10 = vld [vmem:[%s4004_s0 + $0x318] sm:$0xf0] }
 0x137   :  { %v1238_v29 = vadd.f32 %v1237_v63, %v3266_v25  ;;  %v2246_v25 = vld [vmem:[%s4004_s0 + $0x2a8] sm:$0xf0]  ;;  %v2305_v4 = vor.u32 %v2454_v12, %v2302_v10 }
 0x138   :  { %v1291_v8 = vpop.f32.mrf.mxu3  ;;  %v1342_v53 = vpop.f32.mrf.mxu0  ;;  %v2249_v27 = vor.u32 %v2440_v11, %v2246_v25 }
 0x139   :  { %v1292_v2 = vadd.f32 %v1291_v8, %v1238_v29  ;;  %v1343_v56 = vadd.f32 %v1342_v53, %v1289_v54  ;;  %v1396_v30 = vpop.f32.mrf.mxu1  ;;  %1803 = vmatpush.bf16.msrb.mxu1 %v2305_v4 }
 0x13a   :  { %1748 = vmatpush.bf16.msrb.mxu0 %v2249_v27 }
 0x13b   :  { %v3731_v18 = vadd.f32 %v1396_v30, %v1343_v56  ;;  %v2174_v56 = vld [vmem:[%s4004_s0 + $0x218] sm:$0xf0] }
 0x13e   :  { %v1239_v55 = vpop.f32.mrf.mxu2 }
 0x13f   :  { %v1240_v47 = vadd.f32 %v1239_v55, %v3294_v22  ;;  %v71_v22 = vld [vmem:[%s4006_s2 + $0x184] sm:$0xf] }
 0x140   :  { %v1293_v7 = vpop.f32.mrf.mxu3  ;;  %v1345_v13 = vpop.f32.mrf.mxu0  ;;  %v185_v29 = vunpack.c.l.bf16 %v71_v22 }
 0x141   :  { %v1294_v54 = vadd.f32 %v1293_v7, %v1240_v47  ;;  %v1346_v38 = vadd.f32 %v1345_v13, %v1292_v2  ;;  %v1399_v32 = vpop.f32.mrf.mxu1  ;;  %v2422_v2 = vld [vmem:[%s4004_s0 + $0x214] sm:$0xf] }
 0x142   :  { %v2177_v30 = vor.u32 %v2422_v2, %v2174_v56  ;;  %v327_v59 = vmul.f32 %v3514_v52, %v185_v29  ;;  %v2294_v56 = vld [vmem:[%s4004_s0 + $0x308] sm:$0xf0] }
 0x143   :  { %v3744_v31 = vadd.f32 %v1399_v32, %v1346_v38  ;;  %2343 = vmatmul.msk.bf16.gmra.mxu2 %vm1067_vm0, %v3742_v34  ;;  %1555 = vmatmul.bf16.gmra.mxu0 %v3026_v1  ;;  %v2110_v1 = vld [vmem:[%s4004_s0 + $0x198] sm:$0xf0]  ;;  %v2438_v38 = vld [vmem:[%s4004_s0 + $0x294] sm:$0xf] }
 0x144   :  { %1609 = vmatmul.bf16.gmra.mxu1 %v3234_v58  ;;  %v2113_v0 = vor.u32 %v2406_v35, %v2110_v1  ;;  %1695 = vmatpush.bf16.msrb.mxu3 %v2177_v30  ;;  %v2238_v32 = vld [vmem:[%s4004_s0 + $0x298] sm:$0xf0] }
 0x145   :  { %1506 = vmatmul.bf16.gmra.mxu3 %v2689_v19  ;;  %v2241_v39 = vor.u32 %v2438_v38, %v2238_v32  ;;  %v79_v35 = vld [vmem:[%s4006_s2 + $0x1bc] sm:$0xf]  ;;  %v2436_v38 = vld [vmem:[%s4004_s0 + $0x284] sm:$0xf]  ;;  %v83_v32 = vld [vmem:[%s4006_s2 + $0x1d8] sm:$0xf] }
 0x146   :  { %v1242_v19 = vpop.f32.mrf.mxu2  ;;  %1641 = vmatpush.bf16.msrb.mxu2 %v2113_v0 }
 0x147   :  { %v1243_v58 = vadd.f32 %v1242_v19, %v3324_v20  ;;  %v320_v20 = vmul.f32 %v3514_v52, %v178_v42  ;;  %1749 = vmatpush.bf16.msrb.mxu0 %v2241_v39  ;;  %v199_v19 = vunpack.c.l.bf16 %v79_v35 }
 0x148   :  { %v1296_v63 = vpop.f32.mrf.mxu3  ;;  %v1347_v8 = vpop.f32.mrf.mxu0 }
 0x149   :  { %v1297_v50 = vadd.f32 %v1296_v63, %v1243_v58  ;;  %v1348_v41 = vadd.f32 %v1347_v8, %v1294_v54  ;;  %v1401_v53 = vpop.f32.mrf.mxu1  ;;  %v3781_v55 = vpack.c.bf16 %v327_v59, %v320_v20  ;;  %v2102_v63 = vld [vmem:[%s4004_s0 + $0x188] sm:$0xf0]  ;;  %v341_v8 = vmul.f32 %v3514_v52, %v199_v19 }
 0x14b   :  { %v3776_v14 = vadd.f32 %v1401_v53, %v1348_v41  ;;  %v2166_v41 = vld [vmem:[%s4004_s0 + $0x208] sm:$0xf0]  ;;  %v2452_v53 = vld [vmem:[%s4004_s0 + $0x304] sm:$0xf] }
 0x14c   :  { %v2297_v30 = vor.u32 %v2452_v53, %v2294_v56  ;;  %v4068_v53 = vld [vmem:[#allocation5_spill] sm:$0xff] }
 0x14e   :  { %v1244_v11 = vpop.f32.mrf.mxu2  ;;  %1804 = vmatpush.bf16.msrb.mxu1 %v2297_v30 }
 0x14f   :  { %v1245_v25 = vadd.f32 %v1244_v11, %v3346_v16  ;;  %v75_v16 = vld [vmem:[%s4006_s2 + $0x1a0] sm:$0xf] }
 0x150   :  { %v1298_v27 = vpop.f32.mrf.mxu3  ;;  %v1350_v47 = vpop.f32.mrf.mxu0  ;;  %v192_v10 = vunpack.c.l.bf16 %v75_v16 }
 0x151   :  { %v1299_v7 = vadd.f32 %v1298_v27, %v1245_v25  ;;  %v1351_v13 = vadd.f32 %v1350_v47, %v1297_v50  ;;  %v1404_v54 = vpop.f32.mrf.mxu1  ;;  %v2420_v50 = vld [vmem:[%s4004_s0 + $0x204] sm:$0xf] }
 0x152   :  { %v2169_v2 = vor.u32 %v2420_v50, %v2166_v41 }
 0x153   :  { %v3789_v22 = vadd.f32 %v1404_v54, %v1351_v13  ;;  %2344 = vmatmul.msk.bf16.gmra.mxu2 %vm1067_vm0, %v3781_v55  ;;  %1560 = vmatmul.bf16.gmra.mxu0 %v2702_v24 }
 0x154   :  { %1614 = vmatmul.bf16.gmra.mxu1 %v3290_v62  ;;  %v2404_v62 = vld [vmem:[%s4004_s0 + $0x184] sm:$0xf]  ;;  %1696 = vmatpush.bf16.msrb.mxu3 %v2169_v2  ;;  %v4069_v2 = vld [vmem:[#allocation6_spill] sm:$0xff] }
 0x155   :  { %1511 = vmatmul.bf16.gmra.mxu3 %v2814_v33  ;;  %v2105_v42 = vor.u32 %v2404_v62, %v2102_v63 }
 0x156   :  { %v1247_v1 = vpop.f32.mrf.mxu2 }
 0x157   :  { %v1248_v12 = vadd.f32 %v1247_v1, %v3388_v60  ;;  %v334_v60 = vmul.f32 %v3514_v52, %v192_v10  ;;  %1642 = vmatpush.bf16.msrb.mxu2 %v2105_v42 }
 0x158   :  { %v1301_v0 = vpop.f32.mrf.mxu3  ;;  %v1352_v24 = vpop.f32.mrf.mxu0 }
 0x159   :  { %v1302_v4 = vadd.f32 %v1301_v0, %v1248_v12  ;;  %v1353_v33 = vadd.f32 %v1352_v24, %v1299_v7  ;;  %v1406_v58 = vpop.f32.mrf.mxu1  ;;  %v3826_v25 = vpack.c.bf16 %v341_v8, %v334_v60  ;;  %v206_v12 = vunpack.c.l.bf16 %v83_v32 }
 0x15b   :  { %v3809_v29 = vadd.f32 %v1406_v58, %v1353_v33 }
 0x15e   :  { %v1249_v20 = vpop.f32.mrf.mxu2 }
 0x15f   :  { %v1250_v59 = vadd.f32 %v1249_v20, %v3410_v28  ;;  %v2230_v28 = vld [vmem:[%s4004_s0 + $0x288] sm:$0xf0]  ;;  %s2510_s0 = smov [#allocation2]  }
 0x160   :  { %v1303_v11 = vpop.f32.mrf.mxu3  ;;  %v1355_v27 = vpop.f32.mrf.mxu0  ;;  %v2233_v39 = vor.u32 %v2436_v38, %v2230_v28 }
 0x161   :  { %v1304_v47 = vadd.f32 %v1303_v11, %v1250_v59  ;;  %v1356_v7 = vadd.f32 %v1355_v27, %v1302_v4  ;;  %v1409_v13 = vpop.f32.mrf.mxu1  ;;  %v348_v4 = vmul.f32 %v3514_v52, %v206_v12 }
 0x162   :  { %1750 = vmatpush.bf16.msrb.mxu0 %v2233_v39  ;;  %v4071_v39 = vld [vmem:[#allocation7_spill] sm:$0xff] }
 0x163   :  { %v3828_v54 = vadd.f32 %v1409_v13, %v1356_v7  ;;  %2345 = vmatmul.msk.bf16.gmra.mxu2 %vm1067_vm0, %v3826_v25  ;;  %1565 = vmatmul.bf16.gmra.mxu0 %v2818_v36  ;;  %v87_v36 = vld [vmem:[%s4006_s2 + $0x1f4] sm:$0xf]  ;;  %s1892_s2 = sshll.u32 %s2510_s0, 4  ;;  %s1893_s2 = int_to_ptr.vmem [resolvable:$true] %s1892_s2 }
 0x164   :  { %1619 = vmatmul.bf16.gmra.mxu1 %v3342_v3  ;;  %v213_v0 = vunpack.c.l.bf16 %v87_v36 }
 0x165   :  { %1516 = vmatmul.bf16.gmra.mxu3 %v2906_v37 }
 0x166   :  { %v1252_v16 = vpop.f32.mrf.mxu2  ;;  %v355_v33 = vmul.f32 %v3514_v52, %v213_v0  ;;  %v4070_v52 = vld [vmem:[#allocation27_spill] sm:$0xff] }
 0x167   :  { %v1253_v35 = vadd.f32 %v1252_v16, %v3446_v21  ;;  %v4073_v16 = vld [vmem:[#allocation31_spill] sm:$0xff] }
 0x168   :  { %v1306_v1 = vpop.f32.mrf.mxu3  ;;  %v1357_v10 = vpop.f32.mrf.mxu0  ;;  %v3853_v42 = vpack.c.bf16 %v355_v33, %v348_v4 }
 0x169   :  { %v1307_v37 = vadd.f32 %v1306_v1, %v1253_v35  ;;  %v1358_v19 = vadd.f32 %v1357_v10, %v1304_v47  ;;  %v1411_v3 = vpop.f32.mrf.mxu1  ;;  %v4074_v35 = vld [vmem:[#allocation9_spill] sm:$0xff] }
 0x16b   :  { %v3848_v24 = vadd.f32 %v1411_v3, %v1358_v19 }
 0x16e   :  { %v1254_v58 = vpop.f32.mrf.mxu2 }
 0x16f   :  { %v1255_v62 = vadd.f32 %v1254_v58, %v3474_v9 }
 0x170   :  { %v1308_v63 = vpop.f32.mrf.mxu3  ;;  %v1360_v21 = vpop.f32.mrf.mxu0 }
 0x171   :  { %v1309_v60 = vadd.f32 %v1308_v63, %v1255_v62  ;;  %v1361_v8 = vadd.f32 %v1360_v21, %v1307_v37  ;;  %v1414_v50 = vpop.f32.mrf.mxu1 }
 0x173   :  { %v3855_v41 = vadd.f32 %v1414_v50, %v1361_v8  ;;  %2346 = vmatmul.msk.bf16.gmra.mxu2 %vm1067_vm0, %v3853_v42  ;;  %1570 = vmatmul.bf16.gmra.mxu0 %v4068_v53  ;;  %v4077_v8 = vld [vmem:[#allocation12_spill] sm:$0xff] }
 0x174   :  { %1624 = vmatmul.bf16.gmra.mxu1 %v4070_v52 }
 0x175   :  { %1521 = vmatmul.bf16.gmra.mxu3 %v4069_v2 }
 0x176   :  { %v1428_v56 = vpop.f32.mrf.mxu2 }
 0x177   :  { %v1429_v9 = vadd.f32 %v1428_v56, %v3543_v44  ;;  %v4072_v44 = vld [vmem:[#allocation8_spill] sm:$0xff] }
 0x178   :  { %v1482_v30 = vpop.f32.mrf.mxu3  ;;  %v1362_v20 = vpop.f32.mrf.mxu0 }
 0x179   :  { %1851 = vst [vmem:[#allocation2] sm:$0xff] %v1429_v9  ;;  %v1363_v59 = vadd.f32 %v1362_v20, %v1309_v60  ;;  %v1416_v11 = vpop.f32.mrf.mxu1  ;;  %v4075_v60 = vld [vmem:[#allocation10_spill] sm:$0xff] }
 0x17b   :  { %v3863_v27 = vadd.f32 %v1416_v11, %v1363_v59 }
 0x17e   :  { %v1430_v47 = vpop.f32.mrf.mxu2 }
 0x17f   :  { %v1431_v7 = vadd.f32 %v1430_v47, %v3563_v6 }
 0x180   :  { %v1484_v13 = vpop.f32.mrf.mxu3  ;;  %v1536_v38 = vpop.f32.mrf.mxu0 }
 0x181   :  { %1854 = vst [vmem:[#allocation2 + $0x10] sm:$0xff] %v1431_v7  ;;  %v1537_v28 = vadd.f32 %v1536_v38, %v1482_v30  ;;  %v1590_v32 = vpop.f32.mrf.mxu1  ;;  %v4080_v38 = vld [vmem:[#allocation15_spill] sm:$0xff] }
 0x183   :  { %v3866_v36 = vadd.f32 %v1590_v32, %v1537_v28  ;;  %1575 = vmatmul.bf16.gmra.mxu0 %v4071_v39  ;;  %1643 = vmatmul.bf16.vlgmr.msrb.gmra.mxu2 %v4072_v44 }
 0x184   :  { %1629 = vmatmul.bf16.gmra.mxu1 %v4073_v16 }
 0x185   :  { %1697 = vmatmul.bf16.vlgmr.msrb.gmra.mxu3 %v4074_v35 }
 0x186   :  { %v1433_v1 = vpop.f32.mrf.mxu2 }
 0x187   :  { %v1434_v12 = vadd.f32 %v1433_v1, %v3588_v48  ;;  %v4076_v48 = vld [vmem:[#allocation11_spill] sm:$0xff] }
 0x188   :  { %v1487_v0 = vpop.f32.mrf.mxu3  ;;  %v1538_v6 = vpop.f32.mrf.mxu0 }
 0x189   :  { %1856 = vst [vmem:[#allocation2 + $0x20] sm:$0xff] %v1434_v12  ;;  %v1539_v10 = vadd.f32 %v1538_v6, %v1484_v13  ;;  %v1592_v37 = vpop.f32.mrf.mxu1 }
 0x18b   :  { %v3873_v19 = vadd.f32 %v1592_v37, %v1539_v10 }
 0x18e   :  { %v1435_v3 = vpop.f32.mrf.mxu2 }
 0x18f   :  { %v1436_v4 = vadd.f32 %v1435_v3, %v3608_v57 }
 0x190   :  { %v1489_v33 = vpop.f32.mrf.mxu3  ;;  %v1541_v58 = vpop.f32.mrf.mxu0 }
 0x191   :  { %1858 = vst [vmem:[#allocation2 + $0x30] sm:$0xff] %v1436_v4  ;;  %v1542_v62 = vadd.f32 %v1541_v58, %v1487_v0  ;;  %v1595_v63 = vpop.f32.mrf.mxu1  ;;  %v4083_v4 = vld [vmem:[#allocation18_spill] sm:$0xff] }
 0x193   :  { %v3876_v21 = vadd.f32 %v1595_v63, %v1542_v62  ;;  %1648 = vmatmul.bf16.gmra.mxu2 %v4075_v60  ;;  %1751 = vmatmul.bf16.vlgmr.msrb.gmra.mxu0 %v4076_v48 }
 0x194   :  { %2347 = vmatmul.msk.bf16.vlgmr.msrb.gmra.mxu1 %vm1067_vm0, %v3539_v17  ;;  %v4078_v17 = vld [vmem:[#allocation13_spill] sm:$0xff] }
 0x195   :  { %1702 = vmatmul.bf16.gmra.mxu3 %v4077_v8 }
 0x196   :  { %v1438_v50 = vpop.f32.mrf.mxu2 }
 0x197   :  { %v1439_v53 = vadd.f32 %v1438_v50, %v3621_v61  ;;  %v4079_v61 = vld [vmem:[#allocation14_spill] sm:$0xff] }
 0x198   :  { %v1492_v57 = vpop.f32.mrf.mxu3  ;;  %v1543_v2 = vpop.f32.mrf.mxu0 }
 0x199   :  { %1860 = vst [vmem:[#allocation2 + $0x40] sm:$0xff] %v1439_v53  ;;  %v1544_v52 = vadd.f32 %v1543_v2, %v1489_v33  ;;  %v1597_v56 = vpop.f32.mrf.mxu1 }
 0x19b   :  { %v3884_v9 = vadd.f32 %v1597_v56, %v1544_v52 }
 0x19e   :  { %v1440_v30 = vpop.f32.mrf.mxu2 }
 0x19f   :  { %v1441_v20 = vadd.f32 %v1440_v30, %v3647_v43  ;;  %v4086_v30 = vld [vmem:[#allocation21_spill] sm:$0xff] }
 0x1a0   :  { %v1494_v59 = vpop.f32.mrf.mxu3  ;;  %v1546_v11 = vpop.f32.mrf.mxu0 }
 0x1a1   :  { %1862 = vst [vmem:[#allocation2 + $0x50] sm:$0xff] %v1441_v20  ;;  %v1547_v47 = vadd.f32 %v1546_v11, %v1492_v57  ;;  %v1600_v7 = vpop.f32.mrf.mxu1 }
 0x1a3   :  { %v3887_v13 = vadd.f32 %v1600_v7, %v1547_v47  ;;  %1653 = vmatmul.bf16.gmra.mxu2 %v4078_v17  ;;  %1756 = vmatmul.bf16.gmra.mxu0 %v4079_v61 }
 0x1a4   :  { %2348 = vmatmul.msk.bf16.gmra.mxu1 %vm1067_vm0, %v3580_v15  ;;  %v4081_v15 = vld [vmem:[#allocation16_spill] sm:$0xff] }
 0x1a5   :  { %1707 = vmatmul.bf16.gmra.mxu3 %v4080_v38 }
 0x1a6   :  { %v1443_v28 = vpop.f32.mrf.mxu2 }
 0x1a7   :  { %v1444_v32 = vadd.f32 %v1443_v28, %v3660_v46  ;;  %v4082_v46 = vld [vmem:[#allocation17_spill] sm:$0xff] }
 0x1a8   :  { %v1497_v43 = vpop.f32.mrf.mxu3  ;;  %v1548_v39 = vpop.f32.mrf.mxu0 }
 0x1a9   :  { %1864 = vst [vmem:[#allocation2 + $0x60] sm:$0xff] %v1444_v32  ;;  %v1549_v44 = vadd.f32 %v1548_v39, %v1494_v59  ;;  %v1602_v16 = vpop.f32.mrf.mxu1 }
 0x1ab   :  { %v3895_v35 = vadd.f32 %v1602_v16, %v1549_v44  ;;  %v4089_v16 = vld [vmem:[#allocation24_spill] sm:$0xff] }
 0x1ae   :  { %v1445_v1 = vpop.f32.mrf.mxu2 }
 0x1af   :  { %v1446_v12 = vadd.f32 %v1445_v1, %v3686_v45 }
 0x1b0   :  { %v1499_v0 = vpop.f32.mrf.mxu3  ;;  %v1551_v6 = vpop.f32.mrf.mxu0 }
 0x1b1   :  { %1866 = vst [vmem:[#allocation2 + $0x70] sm:$0xff] %v1446_v12  ;;  %v1552_v10 = vadd.f32 %v1551_v6, %v1497_v43  ;;  %v1605_v37 = vpop.f32.mrf.mxu1 }
 0x1b3   :  { %v3898_v3 = vadd.f32 %v1605_v37, %v1552_v10  ;;  %1658 = vmatmul.bf16.gmra.mxu2 %v4081_v15  ;;  %1761 = vmatmul.bf16.gmra.mxu0 %v4082_v46 }
 0x1b4   :  { %2349 = vmatmul.msk.bf16.gmra.mxu1 %vm1067_vm0, %v3613_v51  ;;  %v4084_v51 = vld [vmem:[#allocation19_spill] sm:$0xff] }
 0x1b5   :  { %1712 = vmatmul.bf16.gmra.mxu3 %v4083_v4 }
 0x1b6   :  { %v1448_v33 = vpop.f32.mrf.mxu2 }
 0x1b7   :  { %v1449_v58 = vadd.f32 %v1448_v33, %v3705_v40  ;;  %v4085_v40 = vld [vmem:[#allocation20_spill] sm:$0xff] }
 0x1b8   :  { %v1502_v45 = vpop.f32.mrf.mxu3  ;;  %v1553_v62 = vpop.f32.mrf.mxu0 }
 0x1b9   :  { %1868 = vst [vmem:[#allocation2 + $0x80] sm:$0xff] %v1449_v58  ;;  %v1554_v63 = vadd.f32 %v1553_v62, %v1499_v0  ;;  %v1607_v60 = vpop.f32.mrf.mxu1 }
 0x1bb   :  { %v3906_v48 = vadd.f32 %v1607_v60, %v1554_v63  ;;  %v4092_v63 = vld [vmem:[#allocation28_spill] sm:$0xff] }
 0x1be   :  { %v1450_v8 = vpop.f32.mrf.mxu2 }
 0x1bf   :  { %v1451_v50 = vadd.f32 %v1450_v8, %v3731_v18 }
 0x1c0   :  { %v1504_v53 = vpop.f32.mrf.mxu3  ;;  %v1556_v57 = vpop.f32.mrf.mxu0 }
 0x1c1   :  { %1870 = vst [vmem:[#allocation2 + $0x90] sm:$0xff] %v1451_v50  ;;  %v1557_v2 = vadd.f32 %v1556_v57, %v1502_v45  ;;  %v1610_v52 = vpop.f32.mrf.mxu1 }
 0x1c3   :  { %v3909_v56 = vadd.f32 %v1610_v52, %v1557_v2  ;;  %1663 = vmatmul.bf16.gmra.mxu2 %v4084_v51  ;;  %1766 = vmatmul.bf16.gmra.mxu0 %v4085_v40 }
 0x1c4   :  { %2350 = vmatmul.msk.bf16.gmra.mxu1 %vm1067_vm0, %v3658_v49  ;;  %v4087_v49 = vld [vmem:[#allocation22_spill] sm:$0xff] }
 0x1c5   :  { %1717 = vmatmul.bf16.gmra.mxu3 %v4086_v30 }
 0x1c6   :  { %v1453_v20 = vpop.f32.mrf.mxu2 }
 0x1c7   :  { %v1454_v59 = vadd.f32 %v1453_v20, %v3744_v31  ;;  %v4088_v31 = vld [vmem:[#allocation23_spill] sm:$0xff] }
 0x1c8   :  { %v1507_v18 = vpop.f32.mrf.mxu3  ;;  %v1558_v11 = vpop.f32.mrf.mxu0 }
 0x1c9   :  { %1872 = vst [vmem:[#allocation2 + $0xa0] sm:$0xff] %v1454_v59  ;;  %v1559_v47 = vadd.f32 %v1558_v11, %v1504_v53  ;;  %v1612_v7 = vpop.f32.mrf.mxu1  ;;  %v4095_v11 = vld [vmem:[#allocation32_spill] sm:$0xff] }
 0x1cb   :  { %v3917_v17 = vadd.f32 %v1612_v7, %v1559_v47 }
 0x1ce   :  { %v1455_v61 = vpop.f32.mrf.mxu2 }
 0x1cf   :  { %v1456_v38 = vadd.f32 %v1455_v61, %v3776_v14 }
 0x1d0   :  { %v1509_v28 = vpop.f32.mrf.mxu3  ;;  %v1561_v32 = vpop.f32.mrf.mxu0 }
 0x1d1   :  { %1874 = vst [vmem:[#allocation2 + $0xb0] sm:$0xff] %v1456_v38  ;;  %v1562_v43 = vadd.f32 %v1561_v32, %v1507_v18  ;;  %v1615_v39 = vpop.f32.mrf.mxu1 }
 0x1d3   :  { %v3920_v44 = vadd.f32 %v1615_v39, %v1562_v43  ;;  %1668 = vmatmul.bf16.gmra.mxu2 %v4087_v49  ;;  %1771 = vmatmul.bf16.gmra.mxu0 %v4088_v31 }
 0x1d4   :  { %2351 = vmatmul.msk.bf16.gmra.mxu1 %vm1067_vm0, %v3703_v23  ;;  %v4090_v23 = vld [vmem:[#allocation25_spill] sm:$0xff] }
 0x1d5   :  { %1722 = vmatmul.bf16.gmra.mxu3 %v4089_v16 }
 0x1d6   :  { %v1458_v1 = vpop.f32.mrf.mxu2 }
 0x1d7   :  { %v1459_v12 = vadd.f32 %v1458_v1, %v3789_v22  ;;  %v4091_v22 = vld [vmem:[#allocation26_spill] sm:$0xff] }
 0x1d8   :  { %v1512_v14 = vpop.f32.mrf.mxu3  ;;  %v1563_v0 = vpop.f32.mrf.mxu0 }
 0x1d9   :  { %1876 = vst [vmem:[#allocation2 + $0xc0] sm:$0xff] %v1459_v12  ;;  %v1564_v6 = vadd.f32 %v1563_v0, %v1509_v28  ;;  %v1617_v10 = vpop.f32.mrf.mxu1 }
 0x1db   :  { %v3928_v37 = vadd.f32 %v1617_v10, %v1564_v6 }
 0x1de   :  { %v1460_v15 = vpop.f32.mrf.mxu2 }
 0x1df   :  { %v1461_v46 = vadd.f32 %v1460_v15, %v3809_v29 }
 0x1e0   :  { %v1514_v4 = vpop.f32.mrf.mxu3  ;;  %v1566_v33 = vpop.f32.mrf.mxu0 }
 0x1e1   :  { %1878 = vst [vmem:[#allocation2 + $0xd0] sm:$0xff] %v1461_v46  ;;  %v1567_v58 = vadd.f32 %v1566_v33, %v1512_v14  ;;  %v1620_v45 = vpop.f32.mrf.mxu1 }
 0x1e3   :  { %v3931_v62 = vadd.f32 %v1620_v45, %v1567_v58  ;;  %1673 = vmatmul.bf16.gmra.mxu2 %v4090_v23  ;;  %1776 = vmatmul.bf16.gmra.mxu0 %v4091_v22 }
 0x1e4   :  { %2352 = vmatmul.msk.bf16.gmra.mxu1 %vm1067_vm0, %v3742_v34  ;;  %v4093_v34 = vld [vmem:[#allocation29_spill] sm:$0xff] }
 0x1e5   :  { %1727 = vmatmul.bf16.gmra.mxu3 %v4092_v63 }
 0x1e6   :  { %v1463_v60 = vpop.f32.mrf.mxu2 }
 0x1e7   :  { %v1464_v8 = vadd.f32 %v1463_v60, %v3828_v54  ;;  %v4094_v54 = vld [vmem:[#allocation30_spill] sm:$0xff] }
 0x1e8   :  { %v1517_v29 = vpop.f32.mrf.mxu3  ;;  %v1568_v50 = vpop.f32.mrf.mxu0 }
 0x1e9   :  { %1880 = vst [vmem:[#allocation2 + $0xe0] sm:$0xff] %v1464_v8  ;;  %v1569_v53 = vadd.f32 %v1568_v50, %v1514_v4  ;;  %v1622_v57 = vpop.f32.mrf.mxu1 }
 0x1eb   :  { %v3939_v2 = vadd.f32 %v1622_v57, %v1569_v53 }
 0x1ee   :  { %v1465_v52 = vpop.f32.mrf.mxu2 }
 0x1ef   :  { %v1466_v51 = vadd.f32 %v1465_v52, %v3848_v24 }
 0x1f0   :  { %v1519_v40 = vpop.f32.mrf.mxu3  ;;  %v1571_v30 = vpop.f32.mrf.mxu0 }
 0x1f1   :  { %1882 = vst [vmem:[#allocation2 + $0xf0] sm:$0xff] %v1466_v51  ;;  %v1572_v20 = vadd.f32 %v1571_v30, %v1517_v29  ;;  %v1625_v59 = vpop.f32.mrf.mxu1 }
 0x1f3   :  { %v3942_v18 = vadd.f32 %v1625_v59, %v1572_v20  ;;  %1678 = vmatmul.bf16.gmra.mxu2 %v4093_v34  ;;  %1781 = vmatmul.bf16.gmra.mxu0 %v4094_v54 }
 0x1f4   :  { %2353 = vmatmul.msk.bf16.gmra.mxu1 %vm1067_vm0, %v3781_v55  ;;  %v4096_v55 = vld [vmem:[#allocation33_spill] sm:$0xff] }
 0x1f5   :  { %1732 = vmatmul.bf16.gmra.mxu3 %v4095_v11 }
 0x1f6   :  { %v1468_v47 = vpop.f32.mrf.mxu2 }
 0x1f7   :  { %v1469_v7 = vadd.f32 %v1468_v47, %v3855_v41  ;;  %v4097_v41 = vld [vmem:[#allocation34_spill] sm:$0xff] }
 0x1f8   :  { %v1522_v24 = vpop.f32.mrf.mxu3  ;;  %v1573_v61 = vpop.f32.mrf.mxu0 }
 0x1f9   :  { %1884 = vst [vmem:[#allocation2 + $0x100] sm:$0xff] %v1469_v7  ;;  %v1574_v38 = vadd.f32 %v1573_v61, %v1519_v40  ;;  %v1627_v28 = vpop.f32.mrf.mxu1 }
 0x1fb   :  { %v3950_v32 = vadd.f32 %v1627_v28, %v1574_v38 }
 0x1fe   :  { %v1470_v43 = vpop.f32.mrf.mxu2 }
 0x1ff   :  { %v1471_v39 = vadd.f32 %v1470_v43, %v3863_v27 }
 0x200   :  { %v1524_v49 = vpop.f32.mrf.mxu3  ;;  %v1576_v31 = vpop.f32.mrf.mxu0 }
 0x201   :  { %1886 = vst [vmem:[#allocation2 + $0x110] sm:$0xff] %v1471_v39  ;;  %v1577_v16 = vadd.f32 %v1576_v31, %v1522_v24  ;;  %v1630_v1 = vpop.f32.mrf.mxu1 }
 0x203   :  { %v3953_v12 = vadd.f32 %v1630_v1, %v1577_v16  ;;  %1683 = vmatmul.bf16.gmra.mxu2 %v4096_v55  ;;  %1786 = vmatmul.bf16.gmra.mxu0 %v4097_v41 }
 0x204   :  { %2354 = vmatmul.msk.bf16.gmra.mxu1 %vm1067_vm0, %v3826_v25 }
 0x205   :  { %1737 = vmatmul.bf16.gmra.mxu3 %v3537_v26 }
 0x206   :  { %v1644_v14 = vpop.f32.mrf.mxu2 }
 0x207   :  { %v1645_v15 = vadd.f32 %v1644_v14, %v3866_v36 }
 0x208   :  { %v1698_v0 = vpop.f32.mrf.mxu3  ;;  %v1578_v6 = vpop.f32.mrf.mxu0 }
 0x209   :  { %v1579_v27 = vadd.f32 %v1578_v6, %v1524_v49  ;;  %v1632_v10 = vpop.f32.mrf.mxu1  ;;  %v1699_v33 = vadd.f32 %v1698_v0, %v1645_v15 }
 0x20b   :  { %v3961_v46 = vadd.f32 %v1632_v10, %v1579_v27 }
 0x20e   :  { %v1646_v4 = vpop.f32.mrf.mxu2 }
 0x20f   :  { %v1647_v26 = vadd.f32 %v1646_v4, %v3873_v19 }
 0x210   :  { %v1700_v58 = vpop.f32.mrf.mxu3  ;;  %v1752_v45 = vpop.f32.mrf.mxu0 }
 0x211   :  { %v1753_v23 = vadd.f32 %v1752_v45, %v1699_v33  ;;  %v1806_v22 = vpop.f32.mrf.mxu1  ;;  %v1701_v36 = vadd.f32 %v1700_v58, %v1647_v26 }
 0x213   :  { %v1807_v63 = vadd.f32 %v1806_v22, %v1753_v23  ;;  %1791 = vmatmul.bf16.gmra.mxu0 %v3541_v5 }
 0x214   :  { %2355 = vmatmul.msk.bf16.gmra.mxu1 %vm1067_vm0, %v3853_v42 }
 0x215   :  { %1853 = vst.msk [vmem:[#allocation2 + $0x8] sm:$0xff] %vm1852_vm1, %v1807_v63 }
 0x216   :  { %v1649_v25 = vpop.f32.mrf.mxu2 }
 0x217   :  { %v1650_v53 = vadd.f32 %v1649_v25, %v3876_v21 }
 0x218   :  { %v1703_v60 = vpop.f32.mrf.mxu3  ;;  %v1754_v8 = vpop.f32.mrf.mxu0 }
 0x219   :  { %v1755_v29 = vadd.f32 %v1754_v8, %v1701_v36  ;;  %v1808_v50 = vpop.f32.mrf.mxu1  ;;  %v1704_v52 = vadd.f32 %v1703_v60, %v1650_v53 }
 0x21b   :  { %v1809_v57 = vadd.f32 %v1808_v50, %v1755_v29 }
 0x21d   :  { %1855 = vst.msk [vmem:[#allocation2 + $0x18] sm:$0xff] %vm1852_vm1, %v1809_v57 }
 0x21e   :  { %v1651_v19 = vpop.f32.mrf.mxu2 }
 0x21f   :  { %v1652_v42 = vadd.f32 %v1651_v19, %v3884_v9 }
 0x220   :  { %v1705_v51 = vpop.f32.mrf.mxu3  ;;  %v1757_v5 = vpop.f32.mrf.mxu0 }
 0x221   :  { %v1758_v40 = vadd.f32 %v1757_v5, %v1704_v52  ;;  %v1811_v30 = vpop.f32.mrf.mxu1  ;;  %v1706_v34 = vadd.f32 %v1705_v51, %v1652_v42 }
 0x223   :  { %v1812_v20 = vadd.f32 %v1811_v30, %v1758_v40 }
 0x225   :  { %1857 = vst.msk [vmem:[#allocation2 + $0x28] sm:$0xff] %vm1852_vm1, %v1812_v20 }
 0x226   :  { %v1654_v59 = vpop.f32.mrf.mxu2 }
 0x227   :  { %v1655_v7 = vadd.f32 %v1654_v59, %v3887_v13 }
 0x228   :  { %v1708_v54 = vpop.f32.mrf.mxu3  ;;  %v1759_v11 = vpop.f32.mrf.mxu0 }
 0x229   :  { %v1760_v47 = vadd.f32 %v1759_v11, %v1706_v34  ;;  %v1813_v21 = vpop.f32.mrf.mxu1  ;;  %v1709_v38 = vadd.f32 %v1708_v54, %v1655_v7 }
 0x22b   :  { %v1814_v24 = vadd.f32 %v1813_v21, %v1760_v47 }
 0x22d   :  { %1859 = vst.msk [vmem:[#allocation2 + $0x38] sm:$0xff] %vm1852_vm1, %v1814_v24 }
 0x22e   :  { %v1656_v61 = vpop.f32.mrf.mxu2 }
 0x22f   :  { %v1657_v49 = vadd.f32 %v1656_v61, %v3895_v35 }
 0x230   :  { %v1710_v28 = vpop.f32.mrf.mxu3  ;;  %v1762_v43 = vpop.f32.mrf.mxu0 }
 0x231   :  { %v1763_v39 = vadd.f32 %v1762_v43, %v1709_v38  ;;  %v1816_v9 = vpop.f32.mrf.mxu1  ;;  %v1711_v1 = vadd.f32 %v1710_v28, %v1657_v49 }
 0x233   :  { %v1817_v31 = vadd.f32 %v1816_v9, %v1763_v39 }
 0x235   :  { %1861 = vst.msk [vmem:[#allocation2 + $0x48] sm:$0xff] %vm1852_vm1, %v1817_v31 }
 0x236   :  { %v1659_v16 = vpop.f32.mrf.mxu2 }
 0x237   :  { %v1660_v0 = vadd.f32 %v1659_v16, %v3898_v3 }
 0x238   :  { %v1713_v55 = vpop.f32.mrf.mxu3  ;;  %v1764_v41 = vpop.f32.mrf.mxu0 }
 0x239   :  { %v1765_v14 = vadd.f32 %v1764_v41, %v1711_v1  ;;  %v1818_v13 = vpop.f32.mrf.mxu1  ;;  %v1714_v10 = vadd.f32 %v1713_v55, %v1660_v0 }
 0x23b   :  { %v1819_v6 = vadd.f32 %v1818_v13, %v1765_v14 }
 0x23d   :  { %1863 = vst.msk [vmem:[#allocation2 + $0x58] sm:$0xff] %vm1852_vm1, %v1819_v6 }
 0x23e   :  { %v1661_v27 = vpop.f32.mrf.mxu2 }
 0x23f   :  { %v1662_v58 = vadd.f32 %v1661_v27, %v3906_v48 }
 0x240   :  { %v1715_v15 = vpop.f32.mrf.mxu3  ;;  %v1767_v4 = vpop.f32.mrf.mxu0 }
 0x241   :  { %v1768_v33 = vadd.f32 %v1767_v4, %v1714_v10  ;;  %v1821_v35 = vpop.f32.mrf.mxu1  ;;  %v1716_v22 = vadd.f32 %v1715_v15, %v1662_v58 }
 0x243   :  { %v1822_v45 = vadd.f32 %v1821_v35, %v1768_v33 }
 0x245   :  { %1865 = vst.msk [vmem:[#allocation2 + $0x68] sm:$0xff] %vm1852_vm1, %v1822_v45 }
 0x246   :  { %v1664_v23 = vpop.f32.mrf.mxu2 }
 0x247   :  { %v1665_v36 = vadd.f32 %v1664_v23, %v3909_v56 }
 0x248   :  { %v1718_v26 = vpop.f32.mrf.mxu3  ;;  %v1769_v63 = vpop.f32.mrf.mxu0 }
 0x249   :  { %v1770_v25 = vadd.f32 %v1769_v63, %v1716_v22  ;;  %v1823_v3 = vpop.f32.mrf.mxu1  ;;  %v1719_v29 = vadd.f32 %v1718_v26, %v1665_v36 }
 0x24b   :  { %v1824_v60 = vadd.f32 %v1823_v3, %v1770_v25 }
 0x24d   :  { %1867 = vst.msk [vmem:[#allocation2 + $0x78] sm:$0xff] %vm1852_vm1, %v1824_v60 }
 0x24e   :  { %v1666_v8 = vpop.f32.mrf.mxu2 }
 0x24f   :  { %v1667_v19 = vadd.f32 %v1666_v8, %v3917_v17 }
 0x250   :  { %v1720_v50 = vpop.f32.mrf.mxu3  ;;  %v1772_v53 = vpop.f32.mrf.mxu0 }
 0x251   :  { %v1773_v57 = vadd.f32 %v1772_v53, %v1719_v29  ;;  %v1826_v48 = vpop.f32.mrf.mxu1  ;;  %v1721_v5 = vadd.f32 %v1720_v50, %v1667_v19 }
 0x253   :  { %v1827_v52 = vadd.f32 %v1826_v48, %v1773_v57 }
 0x255   :  { %1869 = vst.msk [vmem:[#allocation2 + $0x88] sm:$0xff] %vm1852_vm1, %v1827_v52 }
 0x256   :  { %v1669_v51 = vpop.f32.mrf.mxu2 }
 0x257   :  { %v1670_v20 = vadd.f32 %v1669_v51, %v3920_v44 }
 0x258   :  { %v1723_v40 = vpop.f32.mrf.mxu3  ;;  %v1774_v30 = vpop.f32.mrf.mxu0 }
 0x259   :  { %v1775_v42 = vadd.f32 %v1774_v30, %v1721_v5  ;;  %v1828_v56 = vpop.f32.mrf.mxu1  ;;  %v1724_v54 = vadd.f32 %v1723_v40, %v1670_v20 }
 0x25b   :  { %v1829_v59 = vadd.f32 %v1828_v56, %v1775_v42 }
 0x25d   :  { %1871 = vst.msk [vmem:[#allocation2 + $0x98] sm:$0xff] %vm1852_vm1, %v1829_v59 }
 0x25e   :  { %v1671_v34 = vpop.f32.mrf.mxu2 }
 0x25f   :  { %v1672_v7 = vadd.f32 %v1671_v34, %v3928_v37 }
 0x260   :  { %v1725_v11 = vpop.f32.mrf.mxu3  ;;  %v1777_v47 = vpop.f32.mrf.mxu0 }
 0x261   :  { %v1778_v21 = vadd.f32 %v1777_v47, %v1724_v54  ;;  %v1831_v17 = vpop.f32.mrf.mxu1  ;;  %v1726_v38 = vadd.f32 %v1725_v11, %v1672_v7 }
 0x263   :  { %v1832_v24 = vadd.f32 %v1831_v17, %v1778_v21 }
 0x265   :  { %1873 = vst.msk [vmem:[#allocation2 + $0xa8] sm:$0xff] %vm1852_vm1, %v1832_v24 }
 0x266   :  { %v1674_v61 = vpop.f32.mrf.mxu2 }
 0x267   :  { %v1675_v9 = vadd.f32 %v1674_v61, %v3931_v62 }
 0x268   :  { %v1728_v28 = vpop.f32.mrf.mxu3  ;;  %v1779_v43 = vpop.f32.mrf.mxu0 }
 0x269   :  { %v1780_v39 = vadd.f32 %v1779_v43, %v1726_v38  ;;  %v1833_v44 = vpop.f32.mrf.mxu1  ;;  %v1729_v16 = vadd.f32 %v1728_v28, %v1675_v9 }
 0x26b   :  { %v1834_v49 = vadd.f32 %v1833_v44, %v1780_v39 }
 0x26d   :  { %1875 = vst.msk [vmem:[#allocation2 + $0xb8] sm:$0xff] %vm1852_vm1, %v1834_v49 }
 0x26e   :  { %v1676_v31 = vpop.f32.mrf.mxu2 }
 0x26f   :  { %v1677_v14 = vadd.f32 %v1676_v31, %v3939_v2 }
 0x270   :  { %v1730_v1 = vpop.f32.mrf.mxu3  ;;  %v1782_v55 = vpop.f32.mrf.mxu0 }
 0x271   :  { %v1783_v41 = vadd.f32 %v1782_v55, %v1729_v16  ;;  %v1836_v37 = vpop.f32.mrf.mxu1  ;;  %v1731_v6 = vadd.f32 %v1730_v1, %v1677_v14 }
 0x273   :  { %v1837_v13 = vadd.f32 %v1836_v37, %v1783_v41 }
 0x275   :  { %1877 = vst.msk [vmem:[#allocation2 + $0xc8] sm:$0xff] %vm1852_vm1, %v1837_v13 }
 0x276   :  { %v1679_v0 = vpop.f32.mrf.mxu2 }
 0x277   :  { %v1680_v4 = vadd.f32 %v1679_v0, %v3942_v18 }
 0x278   :  { %v1733_v27 = vpop.f32.mrf.mxu3  ;;  %v1784_v10 = vpop.f32.mrf.mxu0 }
 0x279   :  { %v1785_v15 = vadd.f32 %v1784_v10, %v1731_v6  ;;  %v1838_v62 = vpop.f32.mrf.mxu1  ;;  %v1734_v58 = vadd.f32 %v1733_v27, %v1680_v4 }
 0x27b   :  { %v1839_v33 = vadd.f32 %v1838_v62, %v1785_v15 }
 0x27d   :  { %1879 = vst.msk [vmem:[#allocation2 + $0xd8] sm:$0xff] %vm1852_vm1, %v1839_v33 }
 0x27e   :  { %v1681_v35 = vpop.f32.mrf.mxu2 }
 0x27f   :  { %v1682_v26 = vadd.f32 %v1681_v35, %v3950_v32 }
 0x280   :  { %v1787_v45 = vpop.f32.mrf.mxu0  ;;  %v1735_v2 = vpop.f32.mrf.mxu3 }
 0x281   :  { %v1788_v23 = vadd.f32 %v1787_v45, %v1734_v58  ;;  %v1841_v22 = vpop.f32.mrf.mxu1  ;;  %v1736_v3 = vadd.f32 %v1735_v2, %v1682_v26 }
 0x283   :  { %v1842_v63 = vadd.f32 %v1841_v22, %v1788_v23 }
 0x285   :  { %1881 = vst.msk [vmem:[#allocation2 + $0xe8] sm:$0xff] %vm1852_vm1, %v1842_v63 }
 0x286   :  { %v1684_v25 = vpop.f32.mrf.mxu2 }
 0x287   :  { %v1685_v18 = vadd.f32 %v1684_v25, %v3953_v12 }
 0x288   :  { %v1789_v36 = vpop.f32.mrf.mxu0  ;;  %v1738_v50 = vpop.f32.mrf.mxu3 }
 0x289   :  { %v1790_v60 = vadd.f32 %v1789_v36, %v1736_v3  ;;  %v1843_v8 = vpop.f32.mrf.mxu1  ;;  %v1739_v53 = vadd.f32 %v1738_v50, %v1685_v18 }
 0x28b   :  { %v1844_v29 = vadd.f32 %v1843_v8, %v1790_v60 }
 0x28d   :  { %1883 = vst.msk [vmem:[#allocation2 + $0xf8] sm:$0xff] %vm1852_vm1, %v1844_v29 }
 0x28e   :  { %v1686_v57 = vpop.f32.mrf.mxu2 }
 0x28f   :  { %v1687_v32 = vadd.f32 %v1686_v57, %v3961_v46 }
 0x290   :  { %v1792_v48 = vpop.f32.mrf.mxu0  ;;  %v1740_v5 = vpop.f32.mrf.mxu3 }
 0x291   :  { %v1793_v19 = vadd.f32 %v1792_v48, %v1739_v53  ;;  %v1846_v52 = vpop.f32.mrf.mxu1  ;;  %v1741_v40 = vadd.f32 %v1740_v5, %v1687_v32 }
 0x293   :  { %v1847_v51 = vadd.f32 %v1846_v52, %v1793_v19 }
 0x295   :  { %1885 = vst.msk [vmem:[#allocation2 + $0x108] sm:$0xff] %vm1852_vm1, %v1847_v51 }
 0x298   :  { %v1794_v12 = vpop.f32.mrf.mxu0 }
 0x299   :  { %v1795_v30 = vadd.f32 %v1794_v12, %v1741_v40  ;;  %v1848_v42 = vpop.f32.mrf.mxu1 }
 0x29b   :  { %v1849_v56 = vadd.f32 %v1848_v42, %v1795_v30 }
 0x29d   :  { %1887 = vst.msk [vmem:[#allocation2 + $0x118] sm:$0xff] %vm1852_vm1, %v1849_v56 }
 0x29e   :  { %1900 = dma.vmem_to_hbm [thread:$0]  %s1893_s2, 4608, %s1895_s22, [#allocation3], %s2511_s23, %s2511_s23, %s2512_s1  }
 0x29f   :  { %2508 = dma.done.wait [#allocation3], 4608  }
 0x2a0   :  { %2509 = vsyncadd [#allocation3], 4294962688 }
 0x2a1   :  { %1905 = vsyncpa [#allocation3], 1 }

</bundles_post_ra>
